<compile_context>
chip_gen: v7x
topology: tpu7x:2x2x1
jax: 0.10.0
libtpu: 0.0.40
codegen_flags: <defaults>
</compile_context>

<pallas_src>
import jax
import jax.numpy as jnp
import numpy as np
from jax.experimental import pallas as pl
from jax.experimental.pallas import tpu as pltpu


def _layer_norm(y, gamma, beta, inv_d):
    # Two-pass (centered) statistics: matches the reference bit-for-bit in f32
    # and avoids E[y^2] - mean^2 cancellation.  XLU reductions have slack under
    # the MXU-bound dots, so the extra pass is effectively free.
    mean = jnp.sum(y, axis=-1, keepdims=True) * inv_d
    yc = y - mean
    var = jnp.sum(yc * yc, axis=-1, keepdims=True) * inv_d
    inv = jax.lax.rsqrt(var + 1e-5)                 # EUP
    return yc * inv * gamma + beta


def fnet_layer_kernel(x_ref, csd_ref, cls_ref,
                      g1_ref, bt1_ref, w1_ref, fb1_ref,
                      w2_ref, fb2_ref, g2_ref, bt2_ref,
                      o_ref, stk_ref):
    Bt, L, D = x_ref.shape
    inv_d = 1.0 / D
    mm_dtype = csd_ref.dtype                        # matmul operand dtype

    # Merged (Bt*L, D) view: layout-preserving leading-dim collapse (L % 8 == 0
    # at production shapes keeps it relayout-free).
    x = x_ref[...].reshape(Bt * L, D)               # float32

    # ---- Fourier mixing stage 1 (fused): [X C_D | X S_D] in one MXU dot ------
    y = jnp.dot(x.astype(mm_dtype), csd_ref[...],
                preferred_element_type=jnp.float32)            # (Bt*L, 2D)
    y3 = y.reshape(Bt, L, 2 * D)
    stk_ref[:, 0:L, :] = y3[:, :, 0:D].astype(mm_dtype)        # X C_D
    stk_ref[:, L:, :] = y3[:, :, D:].astype(mm_dtype)          # X S_D

    # ---- Stage 2: one (L, 2L) x (2L, D) contraction per batch element --------
    # '-' folded into CLS = [C_L | -S_L].  Bt is small & static -> unrolled.
    f = jnp.concatenate(
        [jnp.dot(cls_ref[...], stk_ref[b], preferred_element_type=jnp.float32)
         for b in range(Bt)],
        axis=0)                                                 # (Bt*L, D)

    # ---- residual + LayerNorm1 (dropout = identity at inference) -------------
    h = _layer_norm(x + f, g1_ref[...], bt1_ref[...], inv_d)

    # ---- FeedForward: fc2(relu(fc1(h))) on the merged (Bt*L, D) view ----------
    hid = jnp.dot(h.astype(mm_dtype), w1_ref[...],
                  preferred_element_type=jnp.float32) + fb1_ref[...]
    hid = jnp.maximum(hid, 0.0)
    ff = jnp.dot(hid.astype(mm_dtype), w2_ref[...],
                 preferred_element_type=jnp.float32) + fb2_ref[...]

    # ---- residual + LayerNorm2 ------------------------------------------------
    out = _layer_norm(h + ff, g2_ref[...], bt2_ref[...], inv_d)
    o_ref[...] = out.reshape(Bt, L, D)


def _dft_cos_sin(n):
    # Exact integer (j*k) mod n first, then scale by 2*pi/n (f32-safe angles).
    idx = jnp.arange(n, dtype=jnp.int32)
    prod = (idx[:, None] * idx[None, :]) % n
    ang = prod.astype(jnp.float32) * (2.0 * np.pi / n)
    return jnp.cos(ang), jnp.sin(ang)


def _choose_block_batch(B, L, D):
    """Pick Bt (divisor of B) so Bt*L fills the MXU M dim, within a VMEM cap."""
    # Per-batch-element VMEM (f32): x/out double-buffered blocks + stacked
    # scratch + in-kernel intermediates (y, f, h, hid, ff + slack).
    per_b = (4 + 2 + 12) * L * D * 4
    cap = 24 << 20
    divisors = [d for d in range(1, B + 1) if B % d == 0]
    feasible = [d for d in divisors if d * per_b <= cap] or [1]
    for d in feasible:
        if d * L >= 256:        # 256-row MXU on v6e/v7x (also covers v5e's 128)
            return d
    return feasible[-1]


def fnet_layer(x, params, *, compute_dtype=jnp.float32, block_batch=None):
    """Pallas implementation of FNetLayer.forward (eval mode). Returns (out, None)."""
    B, L, D = x.shape
    x = x.astype(jnp.float32)

    C_L, S_L = _dft_cos_sin(L)
    C_D, S_D = _dft_cos_sin(D)
    CSD = jnp.concatenate([C_D, S_D], axis=1).astype(compute_dtype)    # (D, 2D)
    CLS = jnp.concatenate([C_L, -S_L], axis=1).astype(compute_dtype)   # (L, 2L)

    w1t = params["w1"].T.astype(compute_dtype)          # y = h @ W^T + b
    w2t = params["w2"].T.astype(compute_dtype)
    fb1 = params["b1"].reshape(1, D).astype(jnp.float32)
    fb2 = params["b2"].reshape(1, D).astype(jnp.float32)
    g1 = params["gamma1"].reshape(1, D).astype(jnp.float32)
    bt1 = params["beta1"].reshape(1, D).astype(jnp.float32)
    g2 = params["gamma2"].reshape(1, D).astype(jnp.float32)
    bt2 = params["beta2"].reshape(1, D).astype(jnp.float32)

    Bt = block_batch if block_batch is not None else _choose_block_batch(B, L, D)
    assert B % Bt == 0, "block_batch must divide the batch size"
    grid = (B // Bt,)

    itemsize = jnp.dtype(compute_dtype).itemsize
    # Explicit VMEM budget: blocks (double-buffered), invariants (worst case
    # double-buffered for the fallback path), stacked scratch, intermediates.
    blk_bytes = 2 * 2 * (Bt * L * D * 4)                       # x + out blocks
    inv_bytes = 2 * itemsize * (2 * D * D + 2 * L * L + 2 * D * D)
    vec_bytes = 2 * 4 * (6 * D)
    stk_bytes = Bt * 2 * L * D * itemsize
    tmp_bytes = 12 * Bt * L * D * 4
    working = blk_bytes + inv_bytes + vec_bytes + stk_bytes + tmp_bytes
    vmem_limit = int(min(64 << 20, max(16 << 20, int(1.5 * working) + (2 << 20))))

    # Advisory cost so XLA schedules neighbours (incl. DFT-matrix build) well.
    flops = B * (4 * L * D * D        # fused stage-1 dot (N = 2D)
                 + 4 * L * L * D      # fused stage-2 dot (K = 2L)
                 + 4 * L * D * D)     # FFN fc1 + fc2
    bytes_accessed = (4 * 2 * B * L * D
                      + itemsize * (2 * D * D + 2 * L * L + 2 * D * D)
                      + 4 * 6 * D)
    cost = pl.CostEstimate(flops=flops, transcendentals=2 * B * L,
                           bytes_accessed=bytes_accessed)

    args = (x, CSD, CLS, g1, bt1, w1t, fb1, w2t, fb2, g2, bt2)

    def build(single_buffer_invariants):
        def inv_spec(shape, big=False):
            # Grid-invariant operand: constant index map, fetched once.  Big
            # matrices are single-buffered to reclaim VMEM for larger Bt.
            if big and single_buffer_invariants:
                return pl.BlockSpec(shape, lambda i: (0,) * len(shape),
                                    pipeline_mode=pl.Buffered(1))
            return pl.BlockSpec(shape, lambda i: (0,) * len(shape))

        return pl.pallas_call(
            fnet_layer_kernel,
            out_shape=jax.ShapeDtypeStruct((B, L, D), jnp.float32),
            grid_spec=pltpu.PrefetchScalarGridSpec(
                num_scalar_prefetch=0,
                grid=grid,
                in_specs=[
                    pl.BlockSpec((Bt, L, D), lambda i: (i, 0, 0)),   # x block
                    inv_spec((D, 2 * D), big=True),                  # [C_D | S_D]
                    inv_spec((L, 2 * L), big=True),                  # [C_L | -S_L]
                    inv_spec((1, D)),                                # gamma1
                    inv_spec((1, D)),                                # beta1
                    inv_spec((D, D), big=True),                      # W1^T
                    inv_spec((1, D)),                                # b1
                    inv_spec((D, D), big=True),                      # W2^T
                    inv_spec((1, D)),                                # b2
                    inv_spec((1, D)),                                # gamma2
                    inv_spec((1, D)),                                # beta2
                ],
                out_specs=pl.BlockSpec((Bt, L, D), lambda i: (i, 0, 0)),
                scratch_shapes=[pltpu.VMEM((Bt, 2 * L, D), compute_dtype)],
            ),
            compiler_params=pltpu.CompilerParams(
                dimension_semantics=("parallel",),
                vmem_limit_bytes=vmem_limit),
            cost_estimate=cost,
        )

    try:
        out = jax.block_until_ready(build(True)(*args))
    except Exception:
        # pipeline_mode=pl.Buffered(1) unsupported on this jax build: fall back
        # to default double-buffering (identical results, more VMEM reserved).
        out = jax.block_until_ready(build(False)(*args))
    return out, None


def _reference(x, params):
    """Pure-JAX reference matching FNetLayer.forward (eval mode) exactly."""
    def ln(y, g, b):
        m = jnp.mean(y, axis=-1, keepdims=True)
        v = jnp.mean((y - m) ** 2, axis=-1, keepdims=True)
        return (y - m) / jnp.sqrt(v + 1e-5) * g + b

    f = jnp.real(jnp.fft.fft(jnp.fft.fft(x, axis=2), axis=1)).astype(jnp.float32)
    h = ln(x + f, params["gamma1"], params["beta1"])
    ff = jnp.maximum(h @ params["w1"].T + params["b1"], 0.0) @ params["w2"].T + params["b2"]
    return ln(h + ff, params["gamma2"], params["beta2"])


if __name__ == "__main__":
    B, L, D = 2, 8, 32  # batch, seq, d_model
    key = jax.random.PRNGKey(0)
    kx, k1, k2, k3, k4 = jax.random.split(key, 5)
    x = jax.random.normal(kx, (B, L, D), dtype=jnp.float32)

    # Deterministic parameters (PyTorch-style Linear init; LayerNorm defaults).
    bound = 1.0 / np.sqrt(D)
    params = dict(
        w1=jax.random.uniform(k1, (D, D), jnp.float32, -bound, bound),
        b1=jax.random.uniform(k2, (D,), jnp.float32, -bound, bound),
        w2=jax.random.uniform(k3, (D, D), jnp.float32, -bound, bound),
        b2=jax.random.uniform(k4, (D,), jnp.float32, -bound, bound),
        gamma1=jnp.ones((D,), jnp.float32), beta1=jnp.zeros((D,), jnp.float32),
        gamma2=jnp.ones((D,), jnp.float32), beta2=jnp.zeros((D,), jnp.float32),
    )

    # TODO(synk): training-mode nn.Dropout (stochastic masking) not modeled;
    # forward is implemented in eval mode (dropout = identity).
    out, attn = fnet_layer(x, params)      # compute_dtype=jnp.bfloat16 for prod perf
    out = jax.block_until_ready(out)

    ref = _reference(x, params)
    np.testing.assert_allclose(np.asarray(out), np.asarray(ref), rtol=2e-4, atol=2e-4)
    assert attn is None

    print("KERNEL_OK")
</pallas_src>

<mosaic_0001>
module attributes {stable_mosaic.version = 11 : i64} {
  func.func @fnet_layer_kernel(%arg0: i32, %arg1: memref<2x8x32xf32, #tpu.memory_space<vmem>>, %arg2: memref<32x64xf32, #tpu.memory_space<vmem>>, %arg3: memref<8x16xf32, #tpu.memory_space<vmem>>, %arg4: memref<1x32xf32, #tpu.memory_space<vmem>>, %arg5: memref<1x32xf32, #tpu.memory_space<vmem>>, %arg6: memref<32x32xf32, #tpu.memory_space<vmem>>, %arg7: memref<1x32xf32, #tpu.memory_space<vmem>>, %arg8: memref<32x32xf32, #tpu.memory_space<vmem>>, %arg9: memref<1x32xf32, #tpu.memory_space<vmem>>, %arg10: memref<1x32xf32, #tpu.memory_space<vmem>>, %arg11: memref<1x32xf32, #tpu.memory_space<vmem>>, %arg12: memref<2x8x32xf32, #tpu.memory_space<vmem>>, %arg13: memref<2x16x32xf32, #tpu.memory_space<vmem>>) attributes {dimension_semantics = [#tpu.dimension_semantics<parallel>], iteration_bounds = array<i64: 1>, scalar_prefetch = 0 : i64, scratch_operands = 1 : i64, tpu.core_type = #tpu.core_type<tc>, window_params = [{transform_indices = @transform_0, window_bounds = array<i64: 2, 8, 32>}, {pipeline_mode = #tpu.pipeline_mode<synchronous>, transform_indices = @transform_1, window_bounds = array<i64: 32, 64>}, {pipeline_mode = #tpu.pipeline_mode<synchronous>, transform_indices = @transform_2, window_bounds = array<i64: 8, 16>}, {pipeline_mode = #tpu.pipeline_mode<synchronous>, transform_indices = @transform_3, window_bounds = array<i64: 1, 32>}, {pipeline_mode = #tpu.pipeline_mode<synchronous>, transform_indices = @transform_4, window_bounds = array<i64: 1, 32>}, {pipeline_mode = #tpu.pipeline_mode<synchronous>, transform_indices = @transform_5, window_bounds = array<i64: 32, 32>}, {pipeline_mode = #tpu.pipeline_mode<synchronous>, transform_indices = @transform_6, window_bounds = array<i64: 1, 32>}, {pipeline_mode = #tpu.pipeline_mode<synchronous>, transform_indices = @transform_7, window_bounds = array<i64: 32, 32>}, {pipeline_mode = #tpu.pipeline_mode<synchronous>, transform_indices = @transform_8, window_bounds = array<i64: 1, 32>}, {pipeline_mode = #tpu.pipeline_mode<synchronous>, transform_indices = @transform_9, window_bounds = array<i64: 1, 32>}, {pipeline_mode = #tpu.pipeline_mode<synchronous>, transform_indices = @transform_10, window_bounds = array<i64: 1, 32>}, {transform_indices = @transform_11, window_bounds = array<i64: 2, 8, 32>}]} {
    %c0 = arith.constant 0 : index
    %c0_0 = arith.constant 0 : index
    %c0_1 = arith.constant 0 : index
    %0 = vector.load %arg1[%c0, %c0_0, %c0_1] : memref<2x8x32xf32, #tpu.memory_space<vmem>>, vector<2x8x32xf32>
    %1 = vector.shape_cast %0 : vector<2x8x32xf32> to vector<16x32xf32>
    %c0_2 = arith.constant 0 : index
    %c0_3 = arith.constant 0 : index
    %2 = vector.load %arg2[%c0_2, %c0_3] : memref<32x64xf32, #tpu.memory_space<vmem>>, vector<32x64xf32>
    %cst = arith.constant dense<0.000000e+00> : vector<16x64xf32>
    %3 = tpu.matmul %1, %2, %cst {dimension_numbers = #tpu.dot_dimension_numbers<[1], [0], [0], [1], [0, 0, 1, 1], [], []>} : vector<16x32xf32>, vector<32x64xf32>, vector<16x64xf32> -> vector<16x64xf32>
    %4 = vector.shape_cast %3 : vector<16x64xf32> to vector<2x8x64xf32>
    %5 = vector.extract_strided_slice %4 {offsets = [0, 0, 0], sizes = [2, 8, 32], strides = [1, 1, 1]} : vector<2x8x64xf32> to vector<2x8x32xf32>
    %c0_4 = arith.constant 0 : index
    %c0_5 = arith.constant 0 : index
    %c0_6 = arith.constant 0 : index
    %6 = vector.load %arg13[%c0_4, %c0_5, %c0_6] : memref<2x16x32xf32, #tpu.memory_space<vmem>>, vector<2x8x32xf32>
    tpu.vector_store %arg13[%c0_4, %c0_5, %c0_6], %5 {strides = array<i32>} : memref<2x16x32xf32, #tpu.memory_space<vmem>>, vector<2x8x32xf32>,
    %7 = vector.extract_strided_slice %4 {offsets = [0, 0, 32], sizes = [2, 8, 32], strides = [1, 1, 1]} : vector<2x8x64xf32> to vector<2x8x32xf32>
    %c0_7 = arith.constant 0 : index
    %c8 = arith.constant 8 : index
    %c0_8 = arith.constant 0 : index
    %8 = vector.load %arg13[%c0_7, %c8, %c0_8] : memref<2x16x32xf32, #tpu.memory_space<vmem>>, vector<2x8x32xf32>
    tpu.vector_store %arg13[%c0_7, %c8, %c0_8], %7 {strides = array<i32>} : memref<2x16x32xf32, #tpu.memory_space<vmem>>, vector<2x8x32xf32>,
    %c0_9 = arith.constant 0 : index
    %c0_10 = arith.constant 0 : index
    %9 = vector.load %arg3[%c0_9, %c0_10] : memref<8x16xf32, #tpu.memory_space<vmem>>, vector<8x16xf32>
    %c0_11 = arith.constant 0 : index
    %c0_12 = arith.constant 0 : index
    %c0_13 = arith.constant 0 : index
    %10 = vector.load %arg13[%c0_11, %c0_12, %c0_13] : memref<2x16x32xf32, #tpu.memory_space<vmem>>, vector<1x16x32xf32>
    %11 = vector.shape_cast %10 : vector<1x16x32xf32> to vector<16x32xf32>
    %cst_14 = arith.constant dense<0.000000e+00> : vector<8x32xf32>
    %12 = tpu.matmul %9, %11, %cst_14 {dimension_numbers = #tpu.dot_dimension_numbers<[1], [0], [0], [1], [0, 0, 1, 1], [], []>} : vector<8x16xf32>, vector<16x32xf32>, vector<8x32xf32> -> vector<8x32xf32>
    %c0_15 = arith.constant 0 : index
    %c0_16 = arith.constant 0 : index
    %13 = vector.load %arg3[%c0_15, %c0_16] : memref<8x16xf32, #tpu.memory_space<vmem>>, vector<8x16xf32>
    %c1 = arith.constant 1 : index
    %c0_17 = arith.constant 0 : index
    %c0_18 = arith.constant 0 : index
    %14 = vector.load %arg13[%c1, %c0_17, %c0_18] : memref<2x16x32xf32, #tpu.memory_space<vmem>>, vector<1x16x32xf32>
    %15 = vector.shape_cast %14 : vector<1x16x32xf32> to vector<16x32xf32>
    %cst_19 = arith.constant dense<0.000000e+00> : vector<8x32xf32>
    %16 = tpu.matmul %13, %15, %cst_19 {dimension_numbers = #tpu.dot_dimension_numbers<[1], [0], [0], [1], [0, 0, 1, 1], [], []>} : vector<8x16xf32>, vector<16x32xf32>, vector<8x32xf32> -> vector<8x32xf32>
    %17 = tpu.concatenate %12, %16 in 0 : vector<8x32xf32>, vector<8x32xf32> -> vector<16x32xf32>
    %18 = arith.addf %1, %17 : vector<16x32xf32>
    %c0_20 = arith.constant 0 : index
    %c0_21 = arith.constant 0 : index
    %19 = vector.load %arg4[%c0_20, %c0_21] : memref<1x32xf32, #tpu.memory_space<vmem>>, vector<1x32xf32>
    %c0_22 = arith.constant 0 : index
    %c0_23 = arith.constant 0 : index
    %20 = vector.load %arg5[%c0_22, %c0_23] : memref<1x32xf32, #tpu.memory_space<vmem>>, vector<1x32xf32>
    %cst_24 = arith.constant dense<0.000000e+00> : vector<16xf32>
    %21 = vector.multi_reduction <add>, %18, %cst_24 [1] : vector<16x32xf32> to vector<16xf32>
    %22 = vector.shape_cast %21 : vector<16xf32> to vector<16x1xf32>
    %cst_25 = arith.constant 3.125000e-02 : f32
    %23 = vector.broadcast %cst_25 : f32 to vector<16x1xf32>
    %24 = arith.mulf %22, %23 : vector<16x1xf32>
    %25 = vector.broadcast %24 : vector<16x1xf32> to vector<16x32xf32>
    %26 = arith.subf %18, %25 : vector<16x32xf32>
    %27 = arith.mulf %26, %26 : vector<16x32xf32>
    %cst_26 = arith.constant dense<0.000000e+00> : vector<16xf32>
    %28 = vector.multi_reduction <add>, %27, %cst_26 [1] : vector<16x32xf32> to vector<16xf32>
    %29 = vector.shape_cast %28 : vector<16xf32> to vector<16x1xf32>
    %cst_27 = arith.constant 3.125000e-02 : f32
    %30 = vector.broadcast %cst_27 : f32 to vector<16x1xf32>
    %31 = arith.mulf %29, %30 : vector<16x1xf32>
    %cst_28 = arith.constant 9.99999974E-6 : f32
    %32 = vector.broadcast %cst_28 : f32 to vector<16x1xf32>
    %33 = arith.addf %31, %32 : vector<16x1xf32>
    %34 = math.rsqrt %33 : vector<16x1xf32>
    %35 = vector.broadcast %34 : vector<16x1xf32> to vector<16x32xf32>
    %36 = arith.mulf %26, %35 : vector<16x32xf32>
    %37 = vector.broadcast %19 : vector<1x32xf32> to vector<16x32xf32>
    %38 = arith.mulf %36, %37 : vector<16x32xf32>
    %39 = vector.broadcast %20 : vector<1x32xf32> to vector<16x32xf32>
    %40 = arith.addf %38, %39 : vector<16x32xf32>
    %c0_29 = arith.constant 0 : index
    %c0_30 = arith.constant 0 : index
    %41 = vector.load %arg6[%c0_29, %c0_30] : memref<32x32xf32, #tpu.memory_space<vmem>>, vector<32x32xf32>
    %cst_31 = arith.constant dense<0.000000e+00> : vector<16x32xf32>
    %42 = tpu.matmul %40, %41, %cst_31 {dimension_numbers = #tpu.dot_dimension_numbers<[1], [0], [0], [1], [0, 0, 1, 1], [], []>} : vector<16x32xf32>, vector<32x32xf32>, vector<16x32xf32> -> vector<16x32xf32>
    %c0_32 = arith.constant 0 : index
    %c0_33 = arith.constant 0 : index
    %43 = vector.load %arg7[%c0_32, %c0_33] : memref<1x32xf32, #tpu.memory_space<vmem>>, vector<1x32xf32>
    %44 = vector.broadcast %43 : vector<1x32xf32> to vector<16x32xf32>
    %45 = arith.addf %42, %44 : vector<16x32xf32>
    %cst_34 = arith.constant 0.000000e+00 : f32
    %46 = vector.broadcast %cst_34 : f32 to vector<16x32xf32>
    %47 = arith.maximumf %45, %46 : vector<16x32xf32>
    %c0_35 = arith.constant 0 : index
    %c0_36 = arith.constant 0 : index
    %48 = vector.load %arg8[%c0_35, %c0_36] : memref<32x32xf32, #tpu.memory_space<vmem>>, vector<32x32xf32>
    %cst_37 = arith.constant dense<0.000000e+00> : vector<16x32xf32>
    %49 = tpu.matmul %47, %48, %cst_37 {dimension_numbers = #tpu.dot_dimension_numbers<[1], [0], [0], [1], [0, 0, 1, 1], [], []>} : vector<16x32xf32>, vector<32x32xf32>, vector<16x32xf32> -> vector<16x32xf32>
    %c0_38 = arith.constant 0 : index
    %c0_39 = arith.constant 0 : index
    %50 = vector.load %arg9[%c0_38, %c0_39] : memref<1x32xf32, #tpu.memory_space<vmem>>, vector<1x32xf32>
    %51 = vector.broadcast %50 : vector<1x32xf32> to vector<16x32xf32>
    %52 = arith.addf %49, %51 : vector<16x32xf32>
    %53 = arith.addf %40, %52 : vector<16x32xf32>
    %c0_40 = arith.constant 0 : index
    %c0_41 = arith.constant 0 : index
    %54 = vector.load %arg10[%c0_40, %c0_41] : memref<1x32xf32, #tpu.memory_space<vmem>>, vector<1x32xf32>
    %c0_42 = arith.constant 0 : index
    %c0_43 = arith.constant 0 : index
    %55 = vector.load %arg11[%c0_42, %c0_43] : memref<1x32xf32, #tpu.memory_space<vmem>>, vector<1x32xf32>
    %cst_44 = arith.constant dense<0.000000e+00> : vector<16xf32>
    %56 = vector.multi_reduction <add>, %53, %cst_44 [1] : vector<16x32xf32> to vector<16xf32>
    %57 = vector.shape_cast %56 : vector<16xf32> to vector<16x1xf32>
    %cst_45 = arith.constant 3.125000e-02 : f32
    %58 = vector.broadcast %cst_45 : f32 to vector<16x1xf32>
    %59 = arith.mulf %57, %58 : vector<16x1xf32>
    %60 = vector.broadcast %59 : vector<16x1xf32> to vector<16x32xf32>
    %61 = arith.subf %53, %60 : vector<16x32xf32>
    %62 = arith.mulf %61, %61 : vector<16x32xf32>
    %cst_46 = arith.constant dense<0.000000e+00> : vector<16xf32>
    %63 = vector.multi_reduction <add>, %62, %cst_46 [1] : vector<16x32xf32> to vector<16xf32>
    %64 = vector.shape_cast %63 : vector<16xf32> to vector<16x1xf32>
    %cst_47 = arith.constant 3.125000e-02 : f32
    %65 = vector.broadcast %cst_47 : f32 to vector<16x1xf32>
    %66 = arith.mulf %64, %65 : vector<16x1xf32>
    %cst_48 = arith.constant 9.99999974E-6 : f32
    %67 = vector.broadcast %cst_48 : f32 to vector<16x1xf32>
    %68 = arith.addf %66, %67 : vector<16x1xf32>
    %69 = math.rsqrt %68 : vector<16x1xf32>
    %70 = vector.broadcast %69 : vector<16x1xf32> to vector<16x32xf32>
    %71 = arith.mulf %61, %70 : vector<16x32xf32>
    %72 = vector.broadcast %54 : vector<1x32xf32> to vector<16x32xf32>
    %73 = arith.mulf %71, %72 : vector<16x32xf32>
    %74 = vector.broadcast %55 : vector<1x32xf32> to vector<16x32xf32>
    %75 = arith.addf %73, %74 : vector<16x32xf32>
    %76 = vector.shape_cast %75 : vector<16x32xf32> to vector<2x8x32xf32>
    %c0_49 = arith.constant 0 : index
    %c0_50 = arith.constant 0 : index
    %c0_51 = arith.constant 0 : index
    %77 = vector.load %arg12[%c0_49, %c0_50, %c0_51] : memref<2x8x32xf32, #tpu.memory_space<vmem>>, vector<2x8x32xf32>
    tpu.vector_store %arg12[%c0_49, %c0_50, %c0_51], %76 {strides = array<i32>} : memref<2x8x32xf32, #tpu.memory_space<vmem>>, vector<2x8x32xf32>,
    return
  }
  func.func @transform_0(%arg0: i32) -> (i32, i32, i32) {
    %c0_i32 = arith.constant 0 : i32
    %c0_i32_0 = arith.constant 0 : i32
    %c0_i32_1 = arith.constant 0 : i32
    return %arg0, %c0_i32, %c0_i32_0 : i32, i32, i32
  }
  func.func @transform_1(%arg0: i32) -> (i32, i32) {
    %c0_i32 = arith.constant 0 : i32
    %c0_i32_0 = arith.constant 0 : i32
    %c0_i32_1 = arith.constant 0 : i32
    return %c0_i32, %c0_i32_0 : i32, i32
  }
  func.func @transform_2(%arg0: i32) -> (i32, i32) {
    %c0_i32 = arith.constant 0 : i32
    %c0_i32_0 = arith.constant 0 : i32
    %c0_i32_1 = arith.constant 0 : i32
    return %c0_i32, %c0_i32_0 : i32, i32
  }
  func.func @transform_3(%arg0: i32) -> (i32, i32) {
    %c0_i32 = arith.constant 0 : i32
    %c0_i32_0 = arith.constant 0 : i32
    %c0_i32_1 = arith.constant 0 : i32
    return %c0_i32, %c0_i32_0 : i32, i32
  }
  func.func @transform_4(%arg0: i32) -> (i32, i32) {
    %c0_i32 = arith.constant 0 : i32
    %c0_i32_0 = arith.constant 0 : i32
    %c0_i32_1 = arith.constant 0 : i32
    return %c0_i32, %c0_i32_0 : i32, i32
  }
  func.func @transform_5(%arg0: i32) -> (i32, i32) {
    %c0_i32 = arith.constant 0 : i32
    %c0_i32_0 = arith.constant 0 : i32
    %c0_i32_1 = arith.constant 0 : i32
    return %c0_i32, %c0_i32_0 : i32, i32
  }
  func.func @transform_6(%arg0: i32) -> (i32, i32) {
    %c0_i32 = arith.constant 0 : i32
    %c0_i32_0 = arith.constant 0 : i32
    %c0_i32_1 = arith.constant 0 : i32
    return %c0_i32, %c0_i32_0 : i32, i32
  }
  func.func @transform_7(%arg0: i32) -> (i32, i32) {
    %c0_i32 = arith.constant 0 : i32
    %c0_i32_0 = arith.constant 0 : i32
    %c0_i32_1 = arith.constant 0 : i32
    return %c0_i32, %c0_i32_0 : i32, i32
  }
  func.func @transform_8(%arg0: i32) -> (i32, i32) {
    %c0_i32 = arith.constant 0 : i32
    %c0_i32_0 = arith.constant 0 : i32
    %c0_i32_1 = arith.constant 0 : i32
    return %c0_i32, %c0_i32_0 : i32, i32
  }
  func.func @transform_9(%arg0: i32) -> (i32, i32) {
    %c0_i32 = arith.constant 0 : i32
    %c0_i32_0 = arith.constant 0 : i32
    %c0_i32_1 = arith.constant 0 : i32
    return %c0_i32, %c0_i32_0 : i32, i32
  }
  func.func @transform_10(%arg0: i32) -> (i32, i32) {
    %c0_i32 = arith.constant 0 : i32
    %c0_i32_0 = arith.constant 0 : i32
    %c0_i32_1 = arith.constant 0 : i32
    return %c0_i32, %c0_i32_0 : i32, i32
  }
  func.func @transform_11(%arg0: i32) -> (i32, i32, i32) {
    %c0_i32 = arith.constant 0 : i32
    %c0_i32_0 = arith.constant 0 : i32
    %c0_i32_1 = arith.constant 0 : i32
    return %arg0, %c0_i32, %c0_i32_0 : i32, i32, i32
  }
}

module attributes {stable_mosaic.version = 11 : i64} {
  func.func @fnet_layer_kernel(%arg0: i32, %arg1: memref<2x8x32xf32, #tpu.memory_space<vmem>>, %arg2: memref<32x64xf32, #tpu.memory_space<vmem>>, %arg3: memref<8x16xf32, #tpu.memory_space<vmem>>, %arg4: memref<1x32xf32, #tpu.memory_space<vmem>>, %arg5: memref<1x32xf32, #tpu.memory_space<vmem>>, %arg6: memref<32x32xf32, #tpu.memory_space<vmem>>, %arg7: memref<1x32xf32, #tpu.memory_space<vmem>>, %arg8: memref<32x32xf32, #tpu.memory_space<vmem>>, %arg9: memref<1x32xf32, #tpu.memory_space<vmem>>, %arg10: memref<1x32xf32, #tpu.memory_space<vmem>>, %arg11: memref<1x32xf32, #tpu.memory_space<vmem>>, %arg12: memref<2x8x32xf32, #tpu.memory_space<vmem>>, %arg13: memref<2x16x32xf32, #tpu.memory_space<vmem>>) attributes {dimension_semantics = [#tpu.dimension_semantics<parallel>], iteration_bounds = array<i64: 1>, scalar_prefetch = 0 : i64, scratch_operands = 1 : i64, tpu.core_type = #tpu.core_type<tc>, window_params = [{transform_indices = @transform_0, window_bounds = array<i64: 2, 8, 32>}, {pipeline_mode = #tpu.pipeline_mode<synchronous>, transform_indices = @transform_1, window_bounds = array<i64: 32, 64>}, {pipeline_mode = #tpu.pipeline_mode<synchronous>, transform_indices = @transform_2, window_bounds = array<i64: 8, 16>}, {pipeline_mode = #tpu.pipeline_mode<synchronous>, transform_indices = @transform_3, window_bounds = array<i64: 1, 32>}, {pipeline_mode = #tpu.pipeline_mode<synchronous>, transform_indices = @transform_4, window_bounds = array<i64: 1, 32>}, {pipeline_mode = #tpu.pipeline_mode<synchronous>, transform_indices = @transform_5, window_bounds = array<i64: 32, 32>}, {pipeline_mode = #tpu.pipeline_mode<synchronous>, transform_indices = @transform_6, window_bounds = array<i64: 1, 32>}, {pipeline_mode = #tpu.pipeline_mode<synchronous>, transform_indices = @transform_7, window_bounds = array<i64: 32, 32>}, {pipeline_mode = #tpu.pipeline_mode<synchronous>, transform_indices = @transform_8, window_bounds = array<i64: 1, 32>}, {pipeline_mode = #tpu.pipeline_mode<synchronous>, transform_indices = @transform_9, window_bounds = array<i64: 1, 32>}, {pipeline_mode = #tpu.pipeline_mode<synchronous>, transform_indices = @transform_10, window_bounds = array<i64: 1, 32>}, {transform_indices = @transform_11, window_bounds = array<i64: 2, 8, 32>}]} {
    %c0 = arith.constant 0 : index
    %c0_0 = arith.constant 0 : index
    %c0_1 = arith.constant 0 : index
    %0 = vector.load %arg1[%c0, %c0_0, %c0_1] : memref<2x8x32xf32, #tpu.memory_space<vmem>>, vector<2x8x32xf32>
    %1 = vector.shape_cast %0 : vector<2x8x32xf32> to vector<16x32xf32>
    %c0_2 = arith.constant 0 : index
    %c0_3 = arith.constant 0 : index
    %2 = vector.load %arg2[%c0_2, %c0_3] : memref<32x64xf32, #tpu.memory_space<vmem>>, vector<32x64xf32>
    %cst = arith.constant dense<0.000000e+00> : vector<16x64xf32>
    %3 = tpu.matmul %1, %2, %cst {dimension_numbers = #tpu.dot_dimension_numbers<[1], [0], [0], [1], [0, 0, 1, 1], [], []>} : vector<16x32xf32>, vector<32x64xf32>, vector<16x64xf32> -> vector<16x64xf32>
    %4 = vector.shape_cast %3 : vector<16x64xf32> to vector<2x8x64xf32>
    %5 = vector.extract_strided_slice %4 {offsets = [0, 0, 0], sizes = [2, 8, 32], strides = [1, 1, 1]} : vector<2x8x64xf32> to vector<2x8x32xf32>
    %c0_4 = arith.constant 0 : index
    %c0_5 = arith.constant 0 : index
    %c0_6 = arith.constant 0 : index
    %6 = vector.load %arg13[%c0_4, %c0_5, %c0_6] : memref<2x16x32xf32, #tpu.memory_space<vmem>>, vector<2x8x32xf32>
    tpu.vector_store %arg13[%c0_4, %c0_5, %c0_6], %5 {strides = array<i32>} : memref<2x16x32xf32, #tpu.memory_space<vmem>>, vector<2x8x32xf32>,
    %7 = vector.extract_strided_slice %4 {offsets = [0, 0, 32], sizes = [2, 8, 32], strides = [1, 1, 1]} : vector<2x8x64xf32> to vector<2x8x32xf32>
    %c0_7 = arith.constant 0 : index
    %c8 = arith.constant 8 : index
    %c0_8 = arith.constant 0 : index
    %8 = vector.load %arg13[%c0_7, %c8, %c0_8] : memref<2x16x32xf32, #tpu.memory_space<vmem>>, vector<2x8x32xf32>
    tpu.vector_store %arg13[%c0_7, %c8, %c0_8], %7 {strides = array<i32>} : memref<2x16x32xf32, #tpu.memory_space<vmem>>, vector<2x8x32xf32>,
    %c0_9 = arith.constant 0 : index
    %c0_10 = arith.constant 0 : index
    %9 = vector.load %arg3[%c0_9, %c0_10] : memref<8x16xf32, #tpu.memory_space<vmem>>, vector<8x16xf32>
    %c0_11 = arith.constant 0 : index
    %c0_12 = arith.constant 0 : index
    %c0_13 = arith.constant 0 : index
    %10 = vector.load %arg13[%c0_11, %c0_12, %c0_13] : memref<2x16x32xf32, #tpu.memory_space<vmem>>, vector<1x16x32xf32>
    %11 = vector.shape_cast %10 : vector<1x16x32xf32> to vector<16x32xf32>
    %cst_14 = arith.constant dense<0.000000e+00> : vector<8x32xf32>
    %12 = tpu.matmul %9, %11, %cst_14 {dimension_numbers = #tpu.dot_dimension_numbers<[1], [0], [0], [1], [0, 0, 1, 1], [], []>} : vector<8x16xf32>, vector<16x32xf32>, vector<8x32xf32> -> vector<8x32xf32>
    %c0_15 = arith.constant 0 : index
    %c0_16 = arith.constant 0 : index
    %13 = vector.load %arg3[%c0_15, %c0_16] : memref<8x16xf32, #tpu.memory_space<vmem>>, vector<8x16xf32>
    %c1 = arith.constant 1 : index
    %c0_17 = arith.constant 0 : index
    %c0_18 = arith.constant 0 : index
    %14 = vector.load %arg13[%c1, %c0_17, %c0_18] : memref<2x16x32xf32, #tpu.memory_space<vmem>>, vector<1x16x32xf32>
    %15 = vector.shape_cast %14 : vector<1x16x32xf32> to vector<16x32xf32>
    %cst_19 = arith.constant dense<0.000000e+00> : vector<8x32xf32>
    %16 = tpu.matmul %13, %15, %cst_19 {dimension_numbers = #tpu.dot_dimension_numbers<[1], [0], [0], [1], [0, 0, 1, 1], [], []>} : vector<8x16xf32>, vector<16x32xf32>, vector<8x32xf32> -> vector<8x32xf32>
    %17 = tpu.concatenate %12, %16 in 0 : vector<8x32xf32>, vector<8x32xf32> -> vector<16x32xf32>
    %18 = arith.addf %1, %17 : vector<16x32xf32>
    %c0_20 = arith.constant 0 : index
    %c0_21 = arith.constant 0 : index
    %19 = vector.load %arg4[%c0_20, %c0_21] : memref<1x32xf32, #tpu.memory_space<vmem>>, vector<1x32xf32>
    %c0_22 = arith.constant 0 : index
    %c0_23 = arith.constant 0 : index
    %20 = vector.load %arg5[%c0_22, %c0_23] : memref<1x32xf32, #tpu.memory_space<vmem>>, vector<1x32xf32>
    %cst_24 = arith.constant dense<0.000000e+00> : vector<16xf32>
    %21 = vector.multi_reduction <add>, %18, %cst_24 [1] : vector<16x32xf32> to vector<16xf32>
    %22 = vector.shape_cast %21 : vector<16xf32> to vector<16x1xf32>
    %cst_25 = arith.constant 3.125000e-02 : f32
    %23 = vector.broadcast %cst_25 : f32 to vector<16x1xf32>
    %24 = arith.mulf %22, %23 : vector<16x1xf32>
    %25 = vector.broadcast %24 : vector<16x1xf32> to vector<16x32xf32>
    %26 = arith.subf %18, %25 : vector<16x32xf32>
    %27 = arith.mulf %26, %26 : vector<16x32xf32>
    %cst_26 = arith.constant dense<0.000000e+00> : vector<16xf32>
    %28 = vector.multi_reduction <add>, %27, %cst_26 [1] : vector<16x32xf32> to vector<16xf32>
    %29 = vector.shape_cast %28 : vector<16xf32> to vector<16x1xf32>
    %cst_27 = arith.constant 3.125000e-02 : f32
    %30 = vector.broadcast %cst_27 : f32 to vector<16x1xf32>
    %31 = arith.mulf %29, %30 : vector<16x1xf32>
    %cst_28 = arith.constant 9.99999974E-6 : f32
    %32 = vector.broadcast %cst_28 : f32 to vector<16x1xf32>
    %33 = arith.addf %31, %32 : vector<16x1xf32>
    %34 = math.rsqrt %33 : vector<16x1xf32>
    %35 = vector.broadcast %34 : vector<16x1xf32> to vector<16x32xf32>
    %36 = arith.mulf %26, %35 : vector<16x32xf32>
    %37 = vector.broadcast %19 : vector<1x32xf32> to vector<16x32xf32>
    %38 = arith.mulf %36, %37 : vector<16x32xf32>
    %39 = vector.broadcast %20 : vector<1x32xf32> to vector<16x32xf32>
    %40 = arith.addf %38, %39 : vector<16x32xf32>
    %c0_29 = arith.constant 0 : index
    %c0_30 = arith.constant 0 : index
    %41 = vector.load %arg6[%c0_29, %c0_30] : memref<32x32xf32, #tpu.memory_space<vmem>>, vector<32x32xf32>
    %cst_31 = arith.constant dense<0.000000e+00> : vector<16x32xf32>
    %42 = tpu.matmul %40, %41, %cst_31 {dimension_numbers = #tpu.dot_dimension_numbers<[1], [0], [0], [1], [0, 0, 1, 1], [], []>} : vector<16x32xf32>, vector<32x32xf32>, vector<16x32xf32> -> vector<16x32xf32>
    %c0_32 = arith.constant 0 : index
    %c0_33 = arith.constant 0 : index
    %43 = vector.load %arg7[%c0_32, %c0_33] : memref<1x32xf32, #tpu.memory_space<vmem>>, vector<1x32xf32>
    %44 = vector.broadcast %43 : vector<1x32xf32> to vector<16x32xf32>
    %45 = arith.addf %42, %44 : vector<16x32xf32>
    %cst_34 = arith.constant 0.000000e+00 : f32
    %46 = vector.broadcast %cst_34 : f32 to vector<16x32xf32>
    %47 = arith.maximumf %45, %46 : vector<16x32xf32>
    %c0_35 = arith.constant 0 : index
    %c0_36 = arith.constant 0 : index
    %48 = vector.load %arg8[%c0_35, %c0_36] : memref<32x32xf32, #tpu.memory_space<vmem>>, vector<32x32xf32>
    %cst_37 = arith.constant dense<0.000000e+00> : vector<16x32xf32>
    %49 = tpu.matmul %47, %48, %cst_37 {dimension_numbers = #tpu.dot_dimension_numbers<[1], [0], [0], [1], [0, 0, 1, 1], [], []>} : vector<16x32xf32>, vector<32x32xf32>, vector<16x32xf32> -> vector<16x32xf32>
    %c0_38 = arith.constant 0 : index
    %c0_39 = arith.constant 0 : index
    %50 = vector.load %arg9[%c0_38, %c0_39] : memref<1x32xf32, #tpu.memory_space<vmem>>, vector<1x32xf32>
    %51 = vector.broadcast %50 : vector<1x32xf32> to vector<16x32xf32>
    %52 = arith.addf %49, %51 : vector<16x32xf32>
    %53 = arith.addf %40, %52 : vector<16x32xf32>
    %c0_40 = arith.constant 0 : index
    %c0_41 = arith.constant 0 : index
    %54 = vector.load %arg10[%c0_40, %c0_41] : memref<1x32xf32, #tpu.memory_space<vmem>>, vector<1x32xf32>
    %c0_42 = arith.constant 0 : index
    %c0_43 = arith.constant 0 : index
    %55 = vector.load %arg11[%c0_42, %c0_43] : memref<1x32xf32, #tpu.memory_space<vmem>>, vector<1x32xf32>
    %cst_44 = arith.constant dense<0.000000e+00> : vector<16xf32>
    %56 = vector.multi_reduction <add>, %53, %cst_44 [1] : vector<16x32xf32> to vector<16xf32>
    %57 = vector.shape_cast %56 : vector<16xf32> to vector<16x1xf32>
    %cst_45 = arith.constant 3.125000e-02 : f32
    %58 = vector.broadcast %cst_45 : f32 to vector<16x1xf32>
    %59 = arith.mulf %57, %58 : vector<16x1xf32>
    %60 = vector.broadcast %59 : vector<16x1xf32> to vector<16x32xf32>
    %61 = arith.subf %53, %60 : vector<16x32xf32>
    %62 = arith.mulf %61, %61 : vector<16x32xf32>
    %cst_46 = arith.constant dense<0.000000e+00> : vector<16xf32>
    %63 = vector.multi_reduction <add>, %62, %cst_46 [1] : vector<16x32xf32> to vector<16xf32>
    %64 = vector.shape_cast %63 : vector<16xf32> to vector<16x1xf32>
    %cst_47 = arith.constant 3.125000e-02 : f32
    %65 = vector.broadcast %cst_47 : f32 to vector<16x1xf32>
    %66 = arith.mulf %64, %65 : vector<16x1xf32>
    %cst_48 = arith.constant 9.99999974E-6 : f32
    %67 = vector.broadcast %cst_48 : f32 to vector<16x1xf32>
    %68 = arith.addf %66, %67 : vector<16x1xf32>
    %69 = math.rsqrt %68 : vector<16x1xf32>
    %70 = vector.broadcast %69 : vector<16x1xf32> to vector<16x32xf32>
    %71 = arith.mulf %61, %70 : vector<16x32xf32>
    %72 = vector.broadcast %54 : vector<1x32xf32> to vector<16x32xf32>
    %73 = arith.mulf %71, %72 : vector<16x32xf32>
    %74 = vector.broadcast %55 : vector<1x32xf32> to vector<16x32xf32>
    %75 = arith.addf %73, %74 : vector<16x32xf32>
    %76 = vector.shape_cast %75 : vector<16x32xf32> to vector<2x8x32xf32>
    %c0_49 = arith.constant 0 : index
    %c0_50 = arith.constant 0 : index
    %c0_51 = arith.constant 0 : index
    %77 = vector.load %arg12[%c0_49, %c0_50, %c0_51] : memref<2x8x32xf32, #tpu.memory_space<vmem>>, vector<2x8x32xf32>
    tpu.vector_store %arg12[%c0_49, %c0_50, %c0_51], %76 {strides = array<i32>} : memref<2x8x32xf32, #tpu.memory_space<vmem>>, vector<2x8x32xf32>,
    return
  }
  func.func @transform_0(%arg0: i32) -> (i32, i32, i32) {
    %c0_i32 = arith.constant 0 : i32
    %c0_i32_0 = arith.constant 0 : i32
    %c0_i32_1 = arith.constant 0 : i32
    return %arg0, %c0_i32, %c0_i32_0 : i32, i32, i32
  }
  func.func @transform_1(%arg0: i32) -> (i32, i32) {
    %c0_i32 = arith.constant 0 : i32
    %c0_i32_0 = arith.constant 0 : i32
    %c0_i32_1 = arith.constant 0 : i32
    return %c0_i32, %c0_i32_0 : i32, i32
  }
  func.func @transform_2(%arg0: i32) -> (i32, i32) {
    %c0_i32 = arith.constant 0 : i32
    %c0_i32_0 = arith.constant 0 : i32
    %c0_i32_1 = arith.constant 0 : i32
    return %c0_i32, %c0_i32_0 : i32, i32
  }
  func.func @transform_3(%arg0: i32) -> (i32, i32) {
    %c0_i32 = arith.constant 0 : i32
    %c0_i32_0 = arith.constant 0 : i32
    %c0_i32_1 = arith.constant 0 : i32
    return %c0_i32, %c0_i32_0 : i32, i32
  }
  func.func @transform_4(%arg0: i32) -> (i32, i32) {
    %c0_i32 = arith.constant 0 : i32
    %c0_i32_0 = arith.constant 0 : i32
    %c0_i32_1 = arith.constant 0 : i32
    return %c0_i32, %c0_i32_0 : i32, i32
  }
  func.func @transform_5(%arg0: i32) -> (i32, i32) {
    %c0_i32 = arith.constant 0 : i32
    %c0_i32_0 = arith.constant 0 : i32
    %c0_i32_1 = arith.constant 0 : i32
    return %c0_i32, %c0_i32_0 : i32, i32
  }
  func.func @transform_6(%arg0: i32) -> (i32, i32) {
    %c0_i32 = arith.constant 0 : i32
    %c0_i32_0 = arith.constant 0 : i32
    %c0_i32_1 = arith.constant 0 : i32
    return %c0_i32, %c0_i32_0 : i32, i32
  }
  func.func @transform_7(%arg0: i32) -> (i32, i32) {
    %c0_i32 = arith.constant 0 : i32
    %c0_i32_0 = arith.constant 0 : i32
    %c0_i32_1 = arith.constant 0 : i32
    return %c0_i32, %c0_i32_0 : i32, i32
  }
  func.func @transform_8(%arg0: i32) -> (i32, i32) {
    %c0_i32 = arith.constant 0 : i32
    %c0_i32_0 = arith.constant 0 : i32
    %c0_i32_1 = arith.constant 0 : i32
    return %c0_i32, %c0_i32_0 : i32, i32
  }
  func.func @transform_9(%arg0: i32) -> (i32, i32) {
    %c0_i32 = arith.constant 0 : i32
    %c0_i32_0 = arith.constant 0 : i32
    %c0_i32_1 = arith.constant 0 : i32
    return %c0_i32, %c0_i32_0 : i32, i32
  }
  func.func @transform_10(%arg0: i32) -> (i32, i32) {
    %c0_i32 = arith.constant 0 : i32
    %c0_i32_0 = arith.constant 0 : i32
    %c0_i32_1 = arith.constant 0 : i32
    return %c0_i32, %c0_i32_0 : i32, i32
  }
  func.func @transform_11(%arg0: i32) -> (i32, i32, i32) {
    %c0_i32 = arith.constant 0 : i32
    %c0_i32_0 = arith.constant 0 : i32
    %c0_i32_1 = arith.constant 0 : i32
    return %arg0, %c0_i32, %c0_i32_0 : i32, i32, i32
  }
}

</mosaic_0001>

<bundles_post_ra>
// kernel: tpu_custom_call.1
= control target key start
LH: loop header
LB: loop body
LE: loop exit
PB: predicated region body
PF: predicated region fallthrough
CT: control target
= control target key end

     0   :  { %16 = vsyncpa [#allocation4], 0  ;;  %s1135_s0 = inlined_call_operand.hbm [shape: f32[2,8,32], index: 0, kind: input, shape index: {}]   ;;  %s1136_s1 = inlined_call_operand.hbm [shape: f32[32,64], index: 1, kind: input, shape index: {}]   ;;  %s1137_s2 = inlined_call_operand.hbm [shape: f32[8,16], index: 2, kind: input, shape index: {}]   ;;  %s1138_s3 = inlined_call_operand.vmem [shape: f32[1,32], index: 3, kind: input, shape index: {}]   ;;  %s1139_s4 = inlined_call_operand.vmem [shape: f32[1,32], index: 4, kind: input, shape index: {}]   ;;  %s1140_s5 = inlined_call_operand.hbm [shape: f32[32,32], index: 5, kind: input, shape index: {}]   ;;  %s1141_s6 = inlined_call_operand.vmem [shape: f32[1,32], index: 6, kind: input, shape index: {}]   ;;  %s1142_s7 = inlined_call_operand.hbm [shape: f32[32,32], index: 7, kind: input, shape index: {}]   ;;  %s1143_s8 = inlined_call_operand.vmem [shape: f32[1,32], index: 8, kind: input, shape index: {}]   ;;  %s1144_s9 = inlined_call_operand.vmem [shape: f32[1,32], index: 9, kind: input, shape index: {}]   ;;  %s1145_s10 = inlined_call_operand.vmem [shape: f32[1,32], index: 10, kind: input, shape index: {}]   ;;  %s1146_s11 = inlined_call_operand.hbm [shape: f32[2,8,32], index: 11, kind: output, shape index: {}]  }
   0x1   :  { %17 = vsyncpa [#allocation7], 0 }
   0x2   :  { %18 = vsyncpa [#allocation10], 0 }
   0x3   :  { %19 = vsyncpa [#allocation5], 0  ;;  %s929_s17 = smov [#allocation6]   ;;  %s930_s19 = smov [#allocation9]  }
   0x4   :  { %s37_s18 = sshll.u32 %s929_s17, 4  ;;  %s63_s20 = sshll.u32 %s930_s19, 4  ;;  %s38_s18 = int_to_ptr.vmem [resolvable:$true] %s37_s18  ;;  %s1001_s20 = int_to_ptr.vmem [resolvable:$true] %s63_s20 }
   0x5   :  { %s789_s23 = scalar_lea.hbm %s1136_s1, 512 }
   0x6   :  { %p790_p0 = scmp.ne.s32.totalorder %s1136_s1, %s789_s23  ;;  %p793_p1 = scmp.lt.u32.totalorder %s789_s23, %s1136_s1 }
   0x8   :  { %p795_p2 = pnand %p793_p1, %p790_p0 }
   0xa   :  { %798 = shalt.err (!%p795_p2)
}
   0xb   :  { %s799_s28 = scalar_lea.vmem %s38_s18, 512  ;;  %p804_p4 = scmp.lt.s32.totalorder %s38_s18, %s38_s18 }
   0xc   :  { %p800_p3 = scmp.ne.s32.totalorder %s38_s18, %s799_s28  ;;  %p805_p5 = scmp.lt.s32.totalorder %s799_s28, %s799_s28 }
   0xe   :  { %p806_p6 = por %p805_p5, %p804_p4 }
  0x10   :  { %p807_p7 = pnand %p806_p6, %p800_p3 }
  0x12   :  { %810 = shalt.err (!%p807_p7)
}
  0x13   :  { %s931_s29 = smov 128   ;;  %s932_s30 = smov 8  }
  0x14   :  { %43 = dma.hbm_to_vmem [thread:$0]  %s1136_s1, 512, %s38_s18, [#allocation7], %s931_s29, %s931_s29, %s932_s30  }
  0x15   :  { %s811_s16 = scalar_lea.hbm %s1140_s5, 512 }
  0x16   :  { %p812_p8 = scmp.ne.s32.totalorder %s1140_s5, %s811_s16  ;;  %p815_p9 = scmp.lt.u32.totalorder %s811_s16, %s1140_s5 }
  0x18   :  { %p817_p10 = pnand %p815_p9, %p812_p8 }
  0x1a   :  { %820 = shalt.err (!%p817_p10)
}
  0x1b   :  { %s821_s23 = scalar_lea.vmem %s1001_s20, 512  ;;  %p826_p12 = scmp.lt.s32.totalorder %s1001_s20, %s1001_s20 }
  0x1c   :  { %p822_p11 = scmp.ne.s32.totalorder %s1001_s20, %s821_s23  ;;  %p827_p13 = scmp.lt.s32.totalorder %s821_s23, %s821_s23 }
  0x1e   :  { %p828_p0 = por %p827_p13, %p826_p12 }
  0x20   :  { %p829_p1 = pnand %p828_p0, %p822_p11 }
  0x22   :  { %832 = shalt.err (!%p829_p1)
}
  0x23   :  { %69 = dma.hbm_to_vmem [thread:$0]  %s1140_s5, 512, %s1001_s20, [#allocation10], %s931_s29, %s931_s29, %s932_s30  }
  0x24   :  { %s933_s24 = smov [#allocation3]   ;;  %s934_s26 = smov [#allocation8]  }
  0x25   :  { %s25_s25 = sshll.u32 %s933_s24, 4  ;;  %s50_s27 = sshll.u32 %s934_s26, 4  ;;  %s26_s25 = int_to_ptr.vmem [resolvable:$true] %s25_s25  ;;  %s51_s27 = int_to_ptr.vmem [resolvable:$true] %s50_s27 }
  0x26   :  { %s833_s13 = scalar_lea.hbm %s1135_s0, 256 }
  0x27   :  { %p834_p2 = scmp.ne.s32.totalorder %s1135_s0, %s833_s13  ;;  %p837_p3 = scmp.lt.u32.totalorder %s833_s13, %s1135_s0 }
  0x29   :  { %p839_p4 = pnand %p837_p3, %p834_p2 }
  0x2b   :  { %842 = shalt.err (!%p839_p4)
}
  0x2c   :  { %s843_s5 = scalar_lea.vmem %s26_s25, 256  ;;  %p848_p6 = scmp.lt.s32.totalorder %s26_s25, %s26_s25 }
  0x2d   :  { %p844_p5 = scmp.ne.s32.totalorder %s26_s25, %s843_s5  ;;  %p849_p7 = scmp.lt.s32.totalorder %s843_s5, %s843_s5 }
  0x2f   :  { %p850_p8 = por %p849_p7, %p848_p6 }
  0x31   :  { %p851_p9 = pnand %p850_p8, %p844_p5 }
  0x33   :  { %854 = shalt.err (!%p851_p9)
}
  0x34   :  { %31 = dma.hbm_to_vmem [thread:$0]  %s1135_s0, 256, %s26_s25, [#allocation4], %s931_s29, %s931_s29, %s932_s30  }
  0x35   :  { %s855_s23 = scalar_lea.hbm %s1137_s2, 128 }
  0x36   :  { %p856_p10 = scmp.ne.s32.totalorder %s1137_s2, %s855_s23  ;;  %p859_p11 = scmp.lt.u32.totalorder %s855_s23, %s1137_s2 }
  0x38   :  { %p861_p12 = pnand %p859_p11, %p856_p10 }
  0x3a   :  { %864 = shalt.err (!%p861_p12)
}
  0x3b   :  { %s865_s28 = scalar_lea.vmem %s51_s27, 128  ;;  %p870_p0 = scmp.lt.s32.totalorder %s51_s27, %s51_s27 }
  0x3c   :  { %p866_p13 = scmp.ne.s32.totalorder %s51_s27, %s865_s28  ;;  %p871_p1 = scmp.lt.s32.totalorder %s865_s28, %s865_s28 }
  0x3e   :  { %p872_p2 = por %p871_p1, %p870_p0 }
  0x40   :  { %p873_p3 = pnand %p872_p2, %p866_p13 }
  0x42   :  { %876 = shalt.err (!%p873_p3)
}
  0x43   :  { %53 = dma.hbm_to_vmem [thread:$0]  %s1137_s2, 128, %s51_s27, [#allocation7]  }
  0x44   :  { %s935_s12 = smov [#allocation11]   ;;  %s877_s16 = scalar_lea.hbm %s1142_s7, 512 }
  0x45   :  { %s77_s13 = sshll.u32 %s935_s12, 4  ;;  %p878_p4 = scmp.ne.s32.totalorder %s1142_s7, %s877_s16  ;;  %s78_s13 = int_to_ptr.vmem [resolvable:$true] %s77_s13 }
  0x46   :  { %p881_p5 = scmp.lt.u32.totalorder %s877_s16, %s1142_s7 }
  0x48   :  { %p883_p6 = pnand %p881_p5, %p878_p4 }
  0x4a   :  { %886 = shalt.err (!%p883_p6)
}
  0x4b   :  { %s887_s21 = scalar_lea.vmem %s78_s13, 512  ;;  %p892_p8 = scmp.lt.s32.totalorder %s78_s13, %s78_s13 }
  0x4c   :  { %p888_p7 = scmp.ne.s32.totalorder %s78_s13, %s887_s21  ;;  %p893_p9 = scmp.lt.s32.totalorder %s887_s21, %s887_s21 }
  0x4e   :  { %p894_p10 = por %p893_p9, %p892_p8 }
  0x50   :  { %p895_p11 = pnand %p894_p10, %p888_p7 }
  0x52   :  { %898 = shalt.err (!%p895_p11)
}
  0x53   :  { %83 = dma.hbm_to_vmem [thread:$0]  %s1142_s7, 512, %s78_s13, [#allocation10], %s931_s29, %s931_s29, %s932_s30  }
  0x54   :  { %921 = dma.done.wait [#allocation4], 256  }
  0x55   :  { %922 = vsyncadd [#allocation4], 4294967040 }
  0x56   :  { %923 = dma.done.wait [#allocation7], 640  }
  0x57   :  { %924 = vsyncadd [#allocation7], 4294966656 }
  0x58   :  { %925 = dma.done.wait [#allocation10], 1024  }
  0x59   :  { %926 = vsyncadd [#allocation10], 4294966272  ;;  %vm111_vm0 = vcmask 261120   ;;  %v107_v0 = vld [vmem:[#allocation6] sm:$0xff]  ;;  %v108_v1 = vld [vmem:[#allocation6 + $0x8] sm:$0xff]  ;;  %v936_v8 = vmov 0.0|0.0  }
  0x5a   :  { %v109_v2 = vld [vmem:[#allocation6 + $0x10] sm:$0xff]  ;;  %v739_v3 = vpack.c.bf16 %v108_v1, %v107_v0  ;;  %v110_v4 = vld [vmem:[#allocation6 + $0x18] sm:$0xff]  ;;  %747 = vmatprep.subr.bf16.mxu1 %v936_v8  ;;  %vm937_vm1 = vmmov 0   ;;  %v938_v10 = vmov 0.0   ;;  %s939_s7 = smov 96   ;;  %v205_v17 = vld [vmem:[#allocation8] sm:$0xff] }
  0x5b   :  { %v105_v5 = vld [vmem:[#allocation3] sm:$0xff]  ;;  %v743_v6 = vpack.c.bf16 %v110_v4, %v109_v2  ;;  %v106_v7 = vld [vmem:[#allocation3 + $0x8] sm:$0xff]  ;;  %707 = vmatprep.mubr.msk.f32.mxu1 %vm937_vm1, %v938_v10  ;;  %vm208_vm2 = vcmask 130048   ;;  %v401_v39 = vld [vmem:[#allocation9] sm:$0xff]  ;;  %s940_s25 = smov [#allocation12]  }
  0x5c   :  { %700 = vmatprep.mubr.msk.f32.mxu0 %vm111_vm0, %v105_v5  ;;  %740 = vmatprep.subr.bf16.mxu0 %v739_v3  ;;  %v402_v40 = vld [vmem:[#allocation9 + $0x8] sm:$0xff]  ;;  %v403_v42 = vld [vmem:[#allocation9 + $0x10] sm:$0xff]  ;;  %v404_v43 = vld [vmem:[#allocation9 + $0x18] sm:$0xff]  ;;  %s640_s12 = sshll.u32 %s940_s25, 4  ;;  %s641_s12 = int_to_ptr.vmem [resolvable:$true] %s640_s12 }
  0x5d   :  { %742 = vmatpush3.bf16.msra.mxu0 %v739_v3  ;;  %v753_v41 = vpack.c.bf16 %v402_v40, %v401_v39  ;;  %v757_v44 = vpack.c.bf16 %v404_v43, %v403_v42  ;;  %v495_v45 = vld [vmem:[#allocation11] sm:$0xff]  ;;  %v496_v46 = vld [vmem:[#allocation11 + $0x8] sm:$0xff]  ;;  %v497_v0 = vld [vmem:[#allocation11 + $0x10] sm:$0xff]  ;;  %s899_s13 = scalar_lea.vmem %s641_s12, 256  ;;  %p904_p13 = scmp.lt.s32.totalorder %s641_s12, %s641_s12 }
  0x5e   :  { %744 = vmatprep.subr.bf16.mxu0 %v743_v6  ;;  %v761_v47 = vpack.c.bf16 %v496_v46, %v495_v45  ;;  %v658_v55 = vld [vmem:[%s1138_s3] ss:$0 sm:$0xff]  ;;  %v498_v1 = vld [vmem:[#allocation11 + $0x18] sm:$0xff]  ;;  %p900_p12 = scmp.ne.s32.totalorder %s641_s12, %s899_s13  ;;  %p905_p0 = scmp.lt.s32.totalorder %s899_s13, %s899_s13 }
  0x5f   :  { %v659_v57 = vld [vmem:[%s1139_s4] ss:$0 sm:$0xff]  ;;  %v765_v2 = vpack.c.bf16 %v498_v1, %v497_v0 }
  0x60   :  { %v660_v3 = vld [vmem:[%s1141_s6] ss:$0 sm:$0xff]  ;;  %p906_p1 = por %p905_p0, %p904_p13 }
  0x61   :  { %746 = vmatpush3.bf16.msra.mxu0 %v743_v6 }
  0x62   :  { %754 = vmatprep.subr.bf16.mxu0 %v753_v41  ;;  %p907_p2 = pnand %p906_p1, %p900_p12 }
  0x64   :  { %701 = vmatmul.mubr.msk.f32.vlgmr.msra.gmra.mrb[0].mxu0 %vm111_vm0, %v106_v7 }
  0x65   :  { %756 = vmatpush3.bf16.msra.mxu0 %v753_v41 }
  0x66   :  { %758 = vmatprep.subr.bf16.mxu0 %v757_v44 }
  0x69   :  { %760 = vmatpush3.bf16.msra.mxu0 %v757_v44 }
 0x137   :  { %v702_v9 = vpop.f32.mrb[0].mxu0 }
 0x138   :  { %194 = vst.msk [vmem:[#allocation2 + $0x10] sm:$0xff] %vm111_vm0, %v702_v9  ;;  %v184_v11 = vpop.f32.mrb[1].mxu0 }
 0x139   :  { %193 = vst.msk [vmem:[#allocation2] sm:$0xff] %vm111_vm0, %v184_v11  ;;  %197 = vrot.lane.b32.xlu0 %v184_v11, %s939_s7 }
 0x13d   :  { %199 = vrot.lane.b32.xlu0 %v702_v9, %s939_s7 }
 0x13f   :  { %v283_v18 = vld [vmem:[#allocation2 + $0x10] sm:$0xff] }
 0x140   :  { %v206_v14 = vld [vmem:[#allocation2] sm:$0xff] }
 0x1ab   :  { %v198_v12 = vpop.permute.xlu0 %197 }
 0x1ac   :  { %203 = vst.msk [vmem:[#allocation2 + $0x8] sm:$0xff] %vm111_vm0, %v198_v12 }
 0x1af   :  { %v200_v13 = vpop.permute.xlu0 %199 }
 0x1b0   :  { %204 = vst.msk [vmem:[#allocation2 + $0x18] sm:$0xff] %vm111_vm0, %v200_v13 }
 0x1b3   :  { %v207_v15 = vld [vmem:[#allocation2 + $0x8] sm:$0xff] }
 0x1b4   :  { %v748_v16 = vpack.c.bf16 %v207_v15, %v206_v14 }
 0x1b6   :  { %749 = vmatpush3.bf16.msra.mxu1 %v748_v16 }
 0x1b7   :  { %750 = vmatprep.subr.bf16.mxu1 %v936_v8  ;;  %v284_v19 = vld [vmem:[#allocation2 + $0x18] sm:$0xff] }
 0x1b8   :  { %v751_v20 = vpack.c.bf16 %v284_v19, %v283_v18 }
 0x1b9   :  { %708 = vmatmul.mubr.msk.f32.vlgmr.msra.gmra.mrb[0].mxu1 %vm208_vm2, %v205_v17 }
 0x1ba   :  { %752 = vmatpush3.bf16.msra.mxu1 %v751_v20  ;;  %714 = vmatprep.mubr.msk.f32.mxu1 %vm937_vm1, %v938_v10  ;;  %v663_v10 = vld [vmem:[%s1143_s8] ss:$0 sm:$0xff] }
 0x1bb   :  { %762 = vmatprep.subr.bf16.mxu1 %v761_v47 }
 0x1bd   :  { %715 = vmatmul.mubr.msk.f32.vlgmr.msra.gmra.mrb[2].mxu1 %vm208_vm2, %v205_v17 }
 0x1be   :  { %764 = vmatpush3.bf16.msra.mxu1 %v761_v47 }
 0x1bf   :  { %766 = vmatprep.subr.bf16.mxu1 %v765_v2 }
 0x1c2   :  { %768 = vmatpush3.bf16.msra.mxu1 %v765_v2 }
 0x28c   :  { %v278_v21 = vpop.f32.mrb[0].mxu1 }
 0x28d   :  { %v355_v22 = vadd.f32 %v278_v21, %v105_v5  ;;  %v709_v23 = vpop.f32.mrb[1].mxu1 }
 0x28f   :  { %v359_v24 = vsel %vm111_vm0, %v355_v22, 0.0 }
 0x290   :  { %360 = vadd.xlane.f32.xlu1 %v359_v24  ;;  %v351_v25 = vpop.f32.mrb[2].mxu1 }
 0x291   :  { %v356_v26 = vadd.f32 %v351_v25, %v106_v7  ;;  %v716_v27 = vpop.f32.mrb[3].mxu1 }
 0x293   :  { %v362_v28 = vsel %vm111_vm0, %v356_v26, 0.0 }
 0x294   :  { %363 = vadd.xlane.f32.xlu1 %v362_v28 }
 0x31d   :  { %v361_v29 = vpop.xlane.xlu1 %360 }
 0x31e   :  { %v365_v30 = vmul.f32 0.03125, %v361_v29 }
 0x320   :  { %v367_v31 = vsub.f32 %v355_v22, %v365_v30 }
 0x321   :  { %v364_v32 = vpop.xlane.xlu1 %363 }
 0x322   :  { %v366_v33 = vmul.f32 0.03125, %v364_v32  ;;  %v369_v34 = vmul.f32 %v367_v31, %v367_v31 }
 0x324   :  { %v368_v35 = vsub.f32 %v356_v26, %v366_v33  ;;  %v371_v36 = vsel %vm111_vm0, %v369_v34, 0.0 }
 0x325   :  { %372 = vadd.xlane.f32.xlu0 %v371_v36  ;;  %v666_v36 = vld [vmem:[%s1144_s9] ss:$0 sm:$0xff] }
 0x326   :  { %v370_v37 = vmul.f32 %v368_v35, %v368_v35 }
 0x328   :  { %v374_v38 = vsel %vm111_vm0, %v370_v37, 0.0 }
 0x329   :  { %375 = vadd.xlane.f32.xlu1 %v374_v38  ;;  %v667_v38 = vld [vmem:[%s1145_s10] ss:$0 sm:$0xff] }
 0x3b2   :  { %v373_v48 = vpop.xlane.xlu0 %372 }
 0x3b3   :  { %v377_v49 = vmul.f32 0.03125, %v373_v48 }
 0x3b5   :  { %v379_v50 = vadd.f32 1e-05, %v377_v49 }
 0x3b6   :  { %v376_v51 = vpop.xlane.xlu1 %375 }
 0x3b7   :  { %781 = vrsqrt.f32 %v379_v50  ;;  %v378_v52 = vmul.f32 0.03125, %v376_v51 }
 0x3b9   :  { %v380_v53 = vadd.f32 1e-05, %v378_v52 }
 0x3bb   :  { %783 = vrsqrt.f32 %v380_v53 }
 0x3c1   :  { %v782_v54 = vpop.eup %781 }
 0x3c2   :  { %v383_v56 = vmul.f32 %v782_v54, %v367_v31 }
 0x3c4   :  { %v391_v58 = vmul.f32 %v658_v55, %v383_v56 }
 0x3c5   :  { %v784_v59 = vpop.eup %783 }
 0x3c6   :  { %v384_v60 = vmul.f32 %v784_v59, %v368_v35  ;;  %v399_v61 = vadd.f32 %v659_v57, %v391_v58 }
 0x3c8   :  { %v392_v62 = vmul.f32 %v658_v55, %v384_v60  ;;  %725 = vmatprep.mubr.msk.f32.mxu0 %vm111_vm0, %v399_v61 }
 0x3ca   :  { %v400_v63 = vadd.f32 %v659_v57, %v392_v62 }
 0x3cc   :  { %726 = vmatmul.mubr.msk.f32.vlgmr.msra.gmra.mrb[2].mxu0 %vm111_vm0, %v400_v63 }
 0x49f   :  { %v727_v4 = vpop.f32.mrb[2].mxu0 }
 0x4a0   :  { %v490_v5 = vadd.f32 %v727_v4, %v660_v3  ;;  %v484_v6 = vpop.f32.mrb[3].mxu0 }
 0x4a1   :  { %v485_v7 = vadd.f32 %v660_v3, %v484_v6 }
 0x4a2   :  { %v494_v9 = vmax.f32 %v490_v5, 0.0 }
 0x4a3   :  { %v493_v8 = vmax.f32 %v485_v7, 0.0 }
 0x4a5   :  { %736 = vmatprep.mubr.msk.f32.mxu1 %vm111_vm0, %v493_v8 }
 0x4a6   :  { %737 = vmatmul.mubr.msk.f32.vlgmr.msra.gmra.mrb[4].mxu1 %vm111_vm0, %v494_v9 }
 0x579   :  { %v738_v11 = vpop.f32.mrb[4].mxu1 }
 0x57a   :  { %v578_v12 = vpop.f32.mrb[5].mxu1  ;;  %v584_v13 = vadd.f32 %v738_v11, %v663_v10 }
 0x57b   :  { %v579_v14 = vadd.f32 %v663_v10, %v578_v12 }
 0x57c   :  { %v588_v17 = vadd.f32 %v584_v13, %v400_v63 }
 0x57d   :  { %v587_v15 = vadd.f32 %v579_v14, %v399_v61 }
 0x57e   :  { %v594_v18 = vsel %vm111_vm0, %v588_v17, 0.0 }
 0x57f   :  { %v591_v16 = vsel %vm111_vm0, %v587_v15, 0.0 }
 0x580   :  { %592 = vadd.xlane.f32.xlu1 %v591_v16 }
 0x584   :  { %595 = vadd.xlane.f32.xlu1 %v594_v18 }
 0x60d   :  { %v593_v19 = vpop.xlane.xlu1 %592 }
 0x60e   :  { %v597_v20 = vmul.f32 0.03125, %v593_v19 }
 0x610   :  { %v599_v21 = vsub.f32 %v587_v15, %v597_v20 }
 0x611   :  { %v596_v22 = vpop.xlane.xlu1 %595 }
 0x612   :  { %v598_v23 = vmul.f32 0.03125, %v596_v22  ;;  %v601_v24 = vmul.f32 %v599_v21, %v599_v21 }
 0x614   :  { %v600_v25 = vsub.f32 %v588_v17, %v598_v23  ;;  %v603_v26 = vsel %vm111_vm0, %v601_v24, 0.0 }
 0x615   :  { %604 = vadd.xlane.f32.xlu1 %v603_v26 }
 0x616   :  { %v602_v27 = vmul.f32 %v600_v25, %v600_v25 }
 0x618   :  { %v606_v28 = vsel %vm111_vm0, %v602_v27, 0.0 }
 0x619   :  { %607 = vadd.xlane.f32.xlu1 %v606_v28 }
 0x6a2   :  { %v605_v29 = vpop.xlane.xlu1 %604 }
 0x6a3   :  { %v609_v30 = vmul.f32 0.03125, %v605_v29 }
 0x6a5   :  { %v611_v31 = vadd.f32 1e-05, %v609_v30 }
 0x6a6   :  { %v608_v32 = vpop.xlane.xlu1 %607 }
 0x6a7   :  { %785 = vrsqrt.f32 %v611_v31  ;;  %v610_v33 = vmul.f32 0.03125, %v608_v32 }
 0x6a9   :  { %v612_v34 = vadd.f32 1e-05, %v610_v33 }
 0x6ab   :  { %787 = vrsqrt.f32 %v612_v34 }
 0x6b1   :  { %v786_v35 = vpop.eup %785 }
 0x6b2   :  { %v615_v37 = vmul.f32 %v786_v35, %v599_v21 }
 0x6b4   :  { %v623_v39 = vmul.f32 %v666_v36, %v615_v37 }
 0x6b5   :  { %v788_v40 = vpop.eup %787 }
 0x6b6   :  { %v616_v41 = vmul.f32 %v788_v40, %v600_v25  ;;  %v631_v42 = vadd.f32 %v667_v38, %v623_v39 }
 0x6b8   :  { %v624_v43 = vmul.f32 %v666_v36, %v616_v41  ;;  %633 = vst.msk [vmem:[#allocation12] sm:$0xff] %vm111_vm0, %v631_v42 }
 0x6ba   :  { %v632_v44 = vadd.f32 %v667_v38, %v624_v43 }
 0x6bc   :  { %634 = vst.msk [vmem:[#allocation12 + $0x8] sm:$0xff] %vm111_vm0, %v632_v44 }
 0x6bd   :  { %910 = shalt.err (!%p907_p2)
}
 0x6be   :  { %s911_s14 = scalar_lea.hbm %s1146_s11, 256 }
 0x6bf   :  { %p912_p3 = scmp.ne.s32.totalorder %s1146_s11, %s911_s14  ;;  %p915_p4 = scmp.lt.u32.totalorder %s911_s14, %s1146_s11 }
 0x6c1   :  { %p917_p5 = pnand %p915_p4, %p912_p3 }
 0x6c3   :  { %920 = shalt.err (!%p917_p5)
}
 0x6c4   :  { %646 = dma.vmem_to_hbm [thread:$0]  %s641_s12, 256, %s1146_s11, [#allocation5], %s931_s29, %s931_s29, %s932_s30  }
 0x6c5   :  { %927 = dma.done.wait [#allocation5], 256  }
 0x6c6   :  { %928 = vsyncadd [#allocation5], 4294967040 }
 0x6c7   :  { %650 = vsyncpa [#allocation4], 1 }
 0x6c8   :  { %651 = vsyncpa [#allocation7], 1 }
 0x6c9   :  { %652 = vsyncpa [#allocation10], 1 }
 0x6ca   :  { %653 = vsyncpa [#allocation5], 1 }

// kernel: tpu_custom_call.1
= control target key start
LH: loop header
LB: loop body
LE: loop exit
PB: predicated region body
PF: predicated region fallthrough
CT: control target
= control target key end

     0   :  { %16 = vsyncpa [#allocation4], 0  ;;  %s1135_s0 = inlined_call_operand.hbm [shape: f32[2,8,32], index: 0, kind: input, shape index: {}]   ;;  %s1136_s1 = inlined_call_operand.hbm [shape: f32[32,64], index: 1, kind: input, shape index: {}]   ;;  %s1137_s2 = inlined_call_operand.hbm [shape: f32[8,16], index: 2, kind: input, shape index: {}]   ;;  %s1138_s3 = inlined_call_operand.vmem [shape: f32[1,32], index: 3, kind: input, shape index: {}]   ;;  %s1139_s4 = inlined_call_operand.vmem [shape: f32[1,32], index: 4, kind: input, shape index: {}]   ;;  %s1140_s5 = inlined_call_operand.hbm [shape: f32[32,32], index: 5, kind: input, shape index: {}]   ;;  %s1141_s6 = inlined_call_operand.vmem [shape: f32[1,32], index: 6, kind: input, shape index: {}]   ;;  %s1142_s7 = inlined_call_operand.hbm [shape: f32[32,32], index: 7, kind: input, shape index: {}]   ;;  %s1143_s8 = inlined_call_operand.vmem [shape: f32[1,32], index: 8, kind: input, shape index: {}]   ;;  %s1144_s9 = inlined_call_operand.vmem [shape: f32[1,32], index: 9, kind: input, shape index: {}]   ;;  %s1145_s10 = inlined_call_operand.vmem [shape: f32[1,32], index: 10, kind: input, shape index: {}]   ;;  %s1146_s11 = inlined_call_operand.hbm [shape: f32[2,8,32], index: 11, kind: output, shape index: {}]  }
   0x1   :  { %17 = vsyncpa [#allocation7], 0 }
   0x2   :  { %18 = vsyncpa [#allocation10], 0 }
   0x3   :  { %19 = vsyncpa [#allocation5], 0  ;;  %s929_s17 = smov [#allocation6]   ;;  %s930_s19 = smov [#allocation9]  }
   0x4   :  { %s37_s18 = sshll.u32 %s929_s17, 4  ;;  %s63_s20 = sshll.u32 %s930_s19, 4  ;;  %s38_s18 = int_to_ptr.vmem [resolvable:$true] %s37_s18  ;;  %s1001_s20 = int_to_ptr.vmem [resolvable:$true] %s63_s20 }
   0x5   :  { %s789_s23 = scalar_lea.hbm %s1136_s1, 512 }
   0x6   :  { %p790_p0 = scmp.ne.s32.totalorder %s1136_s1, %s789_s23  ;;  %p793_p1 = scmp.lt.u32.totalorder %s789_s23, %s1136_s1 }
   0x8   :  { %p795_p2 = pnand %p793_p1, %p790_p0 }
   0xa   :  { %798 = shalt.err (!%p795_p2)
}
   0xb   :  { %s799_s28 = scalar_lea.vmem %s38_s18, 512  ;;  %p804_p4 = scmp.lt.s32.totalorder %s38_s18, %s38_s18 }
   0xc   :  { %p800_p3 = scmp.ne.s32.totalorder %s38_s18, %s799_s28  ;;  %p805_p5 = scmp.lt.s32.totalorder %s799_s28, %s799_s28 }
   0xe   :  { %p806_p6 = por %p805_p5, %p804_p4 }
  0x10   :  { %p807_p7 = pnand %p806_p6, %p800_p3 }
  0x12   :  { %810 = shalt.err (!%p807_p7)
}
  0x13   :  { %s931_s29 = smov 128   ;;  %s932_s30 = smov 8  }
  0x14   :  { %43 = dma.hbm_to_vmem [thread:$0]  %s1136_s1, 512, %s38_s18, [#allocation7], %s931_s29, %s931_s29, %s932_s30  }
  0x15   :  { %s811_s16 = scalar_lea.hbm %s1140_s5, 512 }
  0x16   :  { %p812_p8 = scmp.ne.s32.totalorder %s1140_s5, %s811_s16  ;;  %p815_p9 = scmp.lt.u32.totalorder %s811_s16, %s1140_s5 }
  0x18   :  { %p817_p10 = pnand %p815_p9, %p812_p8 }
  0x1a   :  { %820 = shalt.err (!%p817_p10)
}
  0x1b   :  { %s821_s23 = scalar_lea.vmem %s1001_s20, 512  ;;  %p826_p12 = scmp.lt.s32.totalorder %s1001_s20, %s1001_s20 }
  0x1c   :  { %p822_p11 = scmp.ne.s32.totalorder %s1001_s20, %s821_s23  ;;  %p827_p13 = scmp.lt.s32.totalorder %s821_s23, %s821_s23 }
  0x1e   :  { %p828_p0 = por %p827_p13, %p826_p12 }
  0x20   :  { %p829_p1 = pnand %p828_p0, %p822_p11 }
  0x22   :  { %832 = shalt.err (!%p829_p1)
}
  0x23   :  { %69 = dma.hbm_to_vmem [thread:$0]  %s1140_s5, 512, %s1001_s20, [#allocation10], %s931_s29, %s931_s29, %s932_s30  }
  0x24   :  { %s933_s24 = smov [#allocation3]   ;;  %s934_s26 = smov [#allocation8]  }
  0x25   :  { %s25_s25 = sshll.u32 %s933_s24, 4  ;;  %s50_s27 = sshll.u32 %s934_s26, 4  ;;  %s26_s25 = int_to_ptr.vmem [resolvable:$true] %s25_s25  ;;  %s51_s27 = int_to_ptr.vmem [resolvable:$true] %s50_s27 }
  0x26   :  { %s833_s13 = scalar_lea.hbm %s1135_s0, 256 }
  0x27   :  { %p834_p2 = scmp.ne.s32.totalorder %s1135_s0, %s833_s13  ;;  %p837_p3 = scmp.lt.u32.totalorder %s833_s13, %s1135_s0 }
  0x29   :  { %p839_p4 = pnand %p837_p3, %p834_p2 }
  0x2b   :  { %842 = shalt.err (!%p839_p4)
}
  0x2c   :  { %s843_s5 = scalar_lea.vmem %s26_s25, 256  ;;  %p848_p6 = scmp.lt.s32.totalorder %s26_s25, %s26_s25 }
  0x2d   :  { %p844_p5 = scmp.ne.s32.totalorder %s26_s25, %s843_s5  ;;  %p849_p7 = scmp.lt.s32.totalorder %s843_s5, %s843_s5 }
  0x2f   :  { %p850_p8 = por %p849_p7, %p848_p6 }
  0x31   :  { %p851_p9 = pnand %p850_p8, %p844_p5 }
  0x33   :  { %854 = shalt.err (!%p851_p9)
}
  0x34   :  { %31 = dma.hbm_to_vmem [thread:$0]  %s1135_s0, 256, %s26_s25, [#allocation4], %s931_s29, %s931_s29, %s932_s30  }
  0x35   :  { %s855_s23 = scalar_lea.hbm %s1137_s2, 128 }
  0x36   :  { %p856_p10 = scmp.ne.s32.totalorder %s1137_s2, %s855_s23  ;;  %p859_p11 = scmp.lt.u32.totalorder %s855_s23, %s1137_s2 }
  0x38   :  { %p861_p12 = pnand %p859_p11, %p856_p10 }
  0x3a   :  { %864 = shalt.err (!%p861_p12)
}
  0x3b   :  { %s865_s28 = scalar_lea.vmem %s51_s27, 128  ;;  %p870_p0 = scmp.lt.s32.totalorder %s51_s27, %s51_s27 }
  0x3c   :  { %p866_p13 = scmp.ne.s32.totalorder %s51_s27, %s865_s28  ;;  %p871_p1 = scmp.lt.s32.totalorder %s865_s28, %s865_s28 }
  0x3e   :  { %p872_p2 = por %p871_p1, %p870_p0 }
  0x40   :  { %p873_p3 = pnand %p872_p2, %p866_p13 }
  0x42   :  { %876 = shalt.err (!%p873_p3)
}
  0x43   :  { %53 = dma.hbm_to_vmem [thread:$0]  %s1137_s2, 128, %s51_s27, [#allocation7]  }
  0x44   :  { %s935_s12 = smov [#allocation11]   ;;  %s877_s16 = scalar_lea.hbm %s1142_s7, 512 }
  0x45   :  { %s77_s13 = sshll.u32 %s935_s12, 4  ;;  %p878_p4 = scmp.ne.s32.totalorder %s1142_s7, %s877_s16  ;;  %s78_s13 = int_to_ptr.vmem [resolvable:$true] %s77_s13 }
  0x46   :  { %p881_p5 = scmp.lt.u32.totalorder %s877_s16, %s1142_s7 }
  0x48   :  { %p883_p6 = pnand %p881_p5, %p878_p4 }
  0x4a   :  { %886 = shalt.err (!%p883_p6)
}
  0x4b   :  { %s887_s21 = scalar_lea.vmem %s78_s13, 512  ;;  %p892_p8 = scmp.lt.s32.totalorder %s78_s13, %s78_s13 }
  0x4c   :  { %p888_p7 = scmp.ne.s32.totalorder %s78_s13, %s887_s21  ;;  %p893_p9 = scmp.lt.s32.totalorder %s887_s21, %s887_s21 }
  0x4e   :  { %p894_p10 = por %p893_p9, %p892_p8 }
  0x50   :  { %p895_p11 = pnand %p894_p10, %p888_p7 }
  0x52   :  { %898 = shalt.err (!%p895_p11)
}
  0x53   :  { %83 = dma.hbm_to_vmem [thread:$0]  %s1142_s7, 512, %s78_s13, [#allocation10], %s931_s29, %s931_s29, %s932_s30  }
  0x54   :  { %921 = dma.done.wait [#allocation4], 256  }
  0x55   :  { %922 = vsyncadd [#allocation4], 4294967040 }
  0x56   :  { %923 = dma.done.wait [#allocation7], 640  }
  0x57   :  { %924 = vsyncadd [#allocation7], 4294966656 }
  0x58   :  { %925 = dma.done.wait [#allocation10], 1024  }
  0x59   :  { %926 = vsyncadd [#allocation10], 4294966272  ;;  %vm111_vm0 = vcmask 261120   ;;  %v107_v0 = vld [vmem:[#allocation6] sm:$0xff]  ;;  %v108_v1 = vld [vmem:[#allocation6 + $0x8] sm:$0xff]  ;;  %v936_v8 = vmov 0.0|0.0  }
  0x5a   :  { %v109_v2 = vld [vmem:[#allocation6 + $0x10] sm:$0xff]  ;;  %v739_v3 = vpack.c.bf16 %v108_v1, %v107_v0  ;;  %v110_v4 = vld [vmem:[#allocation6 + $0x18] sm:$0xff]  ;;  %747 = vmatprep.subr.bf16.mxu1 %v936_v8  ;;  %vm937_vm1 = vmmov 0   ;;  %v938_v10 = vmov 0.0   ;;  %s939_s7 = smov 96   ;;  %v205_v17 = vld [vmem:[#allocation8] sm:$0xff] }
  0x5b   :  { %v105_v5 = vld [vmem:[#allocation3] sm:$0xff]  ;;  %v743_v6 = vpack.c.bf16 %v110_v4, %v109_v2  ;;  %v106_v7 = vld [vmem:[#allocation3 + $0x8] sm:$0xff]  ;;  %707 = vmatprep.mubr.msk.f32.mxu1 %vm937_vm1, %v938_v10  ;;  %vm208_vm2 = vcmask 130048   ;;  %v401_v39 = vld [vmem:[#allocation9] sm:$0xff]  ;;  %s940_s25 = smov [#allocation12]  }
  0x5c   :  { %700 = vmatprep.mubr.msk.f32.mxu0 %vm111_vm0, %v105_v5  ;;  %740 = vmatprep.subr.bf16.mxu0 %v739_v3  ;;  %v402_v40 = vld [vmem:[#allocation9 + $0x8] sm:$0xff]  ;;  %v403_v42 = vld [vmem:[#allocation9 + $0x10] sm:$0xff]  ;;  %v404_v43 = vld [vmem:[#allocation9 + $0x18] sm:$0xff]  ;;  %s640_s12 = sshll.u32 %s940_s25, 4  ;;  %s641_s12 = int_to_ptr.vmem [resolvable:$true] %s640_s12 }
  0x5d   :  { %742 = vmatpush3.bf16.msra.mxu0 %v739_v3  ;;  %v753_v41 = vpack.c.bf16 %v402_v40, %v401_v39  ;;  %v757_v44 = vpack.c.bf16 %v404_v43, %v403_v42  ;;  %v495_v45 = vld [vmem:[#allocation11] sm:$0xff]  ;;  %v496_v46 = vld [vmem:[#allocation11 + $0x8] sm:$0xff]  ;;  %v497_v0 = vld [vmem:[#allocation11 + $0x10] sm:$0xff]  ;;  %s899_s13 = scalar_lea.vmem %s641_s12, 256  ;;  %p904_p13 = scmp.lt.s32.totalorder %s641_s12, %s641_s12 }
  0x5e   :  { %744 = vmatprep.subr.bf16.mxu0 %v743_v6  ;;  %v761_v47 = vpack.c.bf16 %v496_v46, %v495_v45  ;;  %v658_v55 = vld [vmem:[%s1138_s3] ss:$0 sm:$0xff]  ;;  %v498_v1 = vld [vmem:[#allocation11 + $0x18] sm:$0xff]  ;;  %p900_p12 = scmp.ne.s32.totalorder %s641_s12, %s899_s13  ;;  %p905_p0 = scmp.lt.s32.totalorder %s899_s13, %s899_s13 }
  0x5f   :  { %v659_v57 = vld [vmem:[%s1139_s4] ss:$0 sm:$0xff]  ;;  %v765_v2 = vpack.c.bf16 %v498_v1, %v497_v0 }
  0x60   :  { %v660_v3 = vld [vmem:[%s1141_s6] ss:$0 sm:$0xff]  ;;  %p906_p1 = por %p905_p0, %p904_p13 }
  0x61   :  { %746 = vmatpush3.bf16.msra.mxu0 %v743_v6 }
  0x62   :  { %754 = vmatprep.subr.bf16.mxu0 %v753_v41  ;;  %p907_p2 = pnand %p906_p1, %p900_p12 }
  0x64   :  { %701 = vmatmul.mubr.msk.f32.vlgmr.msra.gmra.mrb[0].mxu0 %vm111_vm0, %v106_v7 }
  0x65   :  { %756 = vmatpush3.bf16.msra.mxu0 %v753_v41 }
  0x66   :  { %758 = vmatprep.subr.bf16.mxu0 %v757_v44 }
  0x69   :  { %760 = vmatpush3.bf16.msra.mxu0 %v757_v44 }
 0x137   :  { %v702_v9 = vpop.f32.mrb[0].mxu0 }
 0x138   :  { %194 = vst.msk [vmem:[#allocation2 + $0x10] sm:$0xff] %vm111_vm0, %v702_v9  ;;  %v184_v11 = vpop.f32.mrb[1].mxu0 }
 0x139   :  { %193 = vst.msk [vmem:[#allocation2] sm:$0xff] %vm111_vm0, %v184_v11  ;;  %197 = vrot.lane.b32.xlu0 %v184_v11, %s939_s7 }
 0x13d   :  { %199 = vrot.lane.b32.xlu0 %v702_v9, %s939_s7 }
 0x13f   :  { %v283_v18 = vld [vmem:[#allocation2 + $0x10] sm:$0xff] }
 0x140   :  { %v206_v14 = vld [vmem:[#allocation2] sm:$0xff] }
 0x1ab   :  { %v198_v12 = vpop.permute.xlu0 %197 }
 0x1ac   :  { %203 = vst.msk [vmem:[#allocation2 + $0x8] sm:$0xff] %vm111_vm0, %v198_v12 }
 0x1af   :  { %v200_v13 = vpop.permute.xlu0 %199 }
 0x1b0   :  { %204 = vst.msk [vmem:[#allocation2 + $0x18] sm:$0xff] %vm111_vm0, %v200_v13 }
 0x1b3   :  { %v207_v15 = vld [vmem:[#allocation2 + $0x8] sm:$0xff] }
 0x1b4   :  { %v748_v16 = vpack.c.bf16 %v207_v15, %v206_v14 }
 0x1b6   :  { %749 = vmatpush3.bf16.msra.mxu1 %v748_v16 }
 0x1b7   :  { %750 = vmatprep.subr.bf16.mxu1 %v936_v8  ;;  %v284_v19 = vld [vmem:[#allocation2 + $0x18] sm:$0xff] }
 0x1b8   :  { %v751_v20 = vpack.c.bf16 %v284_v19, %v283_v18 }
 0x1b9   :  { %708 = vmatmul.mubr.msk.f32.vlgmr.msra.gmra.mrb[0].mxu1 %vm208_vm2, %v205_v17 }
 0x1ba   :  { %752 = vmatpush3.bf16.msra.mxu1 %v751_v20  ;;  %714 = vmatprep.mubr.msk.f32.mxu1 %vm937_vm1, %v938_v10  ;;  %v663_v10 = vld [vmem:[%s1143_s8] ss:$0 sm:$0xff] }
 0x1bb   :  { %762 = vmatprep.subr.bf16.mxu1 %v761_v47 }
 0x1bd   :  { %715 = vmatmul.mubr.msk.f32.vlgmr.msra.gmra.mrb[2].mxu1 %vm208_vm2, %v205_v17 }
 0x1be   :  { %764 = vmatpush3.bf16.msra.mxu1 %v761_v47 }
 0x1bf   :  { %766 = vmatprep.subr.bf16.mxu1 %v765_v2 }
 0x1c2   :  { %768 = vmatpush3.bf16.msra.mxu1 %v765_v2 }
 0x28c   :  { %v278_v21 = vpop.f32.mrb[0].mxu1 }
 0x28d   :  { %v355_v22 = vadd.f32 %v278_v21, %v105_v5  ;;  %v709_v23 = vpop.f32.mrb[1].mxu1 }
 0x28f   :  { %v359_v24 = vsel %vm111_vm0, %v355_v22, 0.0 }
 0x290   :  { %360 = vadd.xlane.f32.xlu1 %v359_v24  ;;  %v351_v25 = vpop.f32.mrb[2].mxu1 }
 0x291   :  { %v356_v26 = vadd.f32 %v351_v25, %v106_v7  ;;  %v716_v27 = vpop.f32.mrb[3].mxu1 }
 0x293   :  { %v362_v28 = vsel %vm111_vm0, %v356_v26, 0.0 }
 0x294   :  { %363 = vadd.xlane.f32.xlu1 %v362_v28 }
 0x31d   :  { %v361_v29 = vpop.xlane.xlu1 %360 }
 0x31e   :  { %v365_v30 = vmul.f32 0.03125, %v361_v29 }
 0x320   :  { %v367_v31 = vsub.f32 %v355_v22, %v365_v30 }
 0x321   :  { %v364_v32 = vpop.xlane.xlu1 %363 }
 0x322   :  { %v366_v33 = vmul.f32 0.03125, %v364_v32  ;;  %v369_v34 = vmul.f32 %v367_v31, %v367_v31 }
 0x324   :  { %v368_v35 = vsub.f32 %v356_v26, %v366_v33  ;;  %v371_v36 = vsel %vm111_vm0, %v369_v34, 0.0 }
 0x325   :  { %372 = vadd.xlane.f32.xlu0 %v371_v36  ;;  %v666_v36 = vld [vmem:[%s1144_s9] ss:$0 sm:$0xff] }
 0x326   :  { %v370_v37 = vmul.f32 %v368_v35, %v368_v35 }
 0x328   :  { %v374_v38 = vsel %vm111_vm0, %v370_v37, 0.0 }
 0x329   :  { %375 = vadd.xlane.f32.xlu1 %v374_v38  ;;  %v667_v38 = vld [vmem:[%s1145_s10] ss:$0 sm:$0xff] }
 0x3b2   :  { %v373_v48 = vpop.xlane.xlu0 %372 }
 0x3b3   :  { %v377_v49 = vmul.f32 0.03125, %v373_v48 }
 0x3b5   :  { %v379_v50 = vadd.f32 1e-05, %v377_v49 }
 0x3b6   :  { %v376_v51 = vpop.xlane.xlu1 %375 }
 0x3b7   :  { %781 = vrsqrt.f32 %v379_v50  ;;  %v378_v52 = vmul.f32 0.03125, %v376_v51 }
 0x3b9   :  { %v380_v53 = vadd.f32 1e-05, %v378_v52 }
 0x3bb   :  { %783 = vrsqrt.f32 %v380_v53 }
 0x3c1   :  { %v782_v54 = vpop.eup %781 }
 0x3c2   :  { %v383_v56 = vmul.f32 %v782_v54, %v367_v31 }
 0x3c4   :  { %v391_v58 = vmul.f32 %v658_v55, %v383_v56 }
 0x3c5   :  { %v784_v59 = vpop.eup %783 }
 0x3c6   :  { %v384_v60 = vmul.f32 %v784_v59, %v368_v35  ;;  %v399_v61 = vadd.f32 %v659_v57, %v391_v58 }
 0x3c8   :  { %v392_v62 = vmul.f32 %v658_v55, %v384_v60  ;;  %725 = vmatprep.mubr.msk.f32.mxu0 %vm111_vm0, %v399_v61 }
 0x3ca   :  { %v400_v63 = vadd.f32 %v659_v57, %v392_v62 }
 0x3cc   :  { %726 = vmatmul.mubr.msk.f32.vlgmr.msra.gmra.mrb[2].mxu0 %vm111_vm0, %v400_v63 }
 0x49f   :  { %v727_v4 = vpop.f32.mrb[2].mxu0 }
 0x4a0   :  { %v490_v5 = vadd.f32 %v727_v4, %v660_v3  ;;  %v484_v6 = vpop.f32.mrb[3].mxu0 }
 0x4a1   :  { %v485_v7 = vadd.f32 %v660_v3, %v484_v6 }
 0x4a2   :  { %v494_v9 = vmax.f32 %v490_v5, 0.0 }
 0x4a3   :  { %v493_v8 = vmax.f32 %v485_v7, 0.0 }
 0x4a5   :  { %736 = vmatprep.mubr.msk.f32.mxu1 %vm111_vm0, %v493_v8 }
 0x4a6   :  { %737 = vmatmul.mubr.msk.f32.vlgmr.msra.gmra.mrb[4].mxu1 %vm111_vm0, %v494_v9 }
 0x579   :  { %v738_v11 = vpop.f32.mrb[4].mxu1 }
 0x57a   :  { %v578_v12 = vpop.f32.mrb[5].mxu1  ;;  %v584_v13 = vadd.f32 %v738_v11, %v663_v10 }
 0x57b   :  { %v579_v14 = vadd.f32 %v663_v10, %v578_v12 }
 0x57c   :  { %v588_v17 = vadd.f32 %v584_v13, %v400_v63 }
 0x57d   :  { %v587_v15 = vadd.f32 %v579_v14, %v399_v61 }
 0x57e   :  { %v594_v18 = vsel %vm111_vm0, %v588_v17, 0.0 }
 0x57f   :  { %v591_v16 = vsel %vm111_vm0, %v587_v15, 0.0 }
 0x580   :  { %592 = vadd.xlane.f32.xlu1 %v591_v16 }
 0x584   :  { %595 = vadd.xlane.f32.xlu1 %v594_v18 }
 0x60d   :  { %v593_v19 = vpop.xlane.xlu1 %592 }
 0x60e   :  { %v597_v20 = vmul.f32 0.03125, %v593_v19 }
 0x610   :  { %v599_v21 = vsub.f32 %v587_v15, %v597_v20 }
 0x611   :  { %v596_v22 = vpop.xlane.xlu1 %595 }
 0x612   :  { %v598_v23 = vmul.f32 0.03125, %v596_v22  ;;  %v601_v24 = vmul.f32 %v599_v21, %v599_v21 }
 0x614   :  { %v600_v25 = vsub.f32 %v588_v17, %v598_v23  ;;  %v603_v26 = vsel %vm111_vm0, %v601_v24, 0.0 }
 0x615   :  { %604 = vadd.xlane.f32.xlu1 %v603_v26 }
 0x616   :  { %v602_v27 = vmul.f32 %v600_v25, %v600_v25 }
 0x618   :  { %v606_v28 = vsel %vm111_vm0, %v602_v27, 0.0 }
 0x619   :  { %607 = vadd.xlane.f32.xlu1 %v606_v28 }
 0x6a2   :  { %v605_v29 = vpop.xlane.xlu1 %604 }
 0x6a3   :  { %v609_v30 = vmul.f32 0.03125, %v605_v29 }
 0x6a5   :  { %v611_v31 = vadd.f32 1e-05, %v609_v30 }
 0x6a6   :  { %v608_v32 = vpop.xlane.xlu1 %607 }
 0x6a7   :  { %785 = vrsqrt.f32 %v611_v31  ;;  %v610_v33 = vmul.f32 0.03125, %v608_v32 }
 0x6a9   :  { %v612_v34 = vadd.f32 1e-05, %v610_v33 }
 0x6ab   :  { %787 = vrsqrt.f32 %v612_v34 }
 0x6b1   :  { %v786_v35 = vpop.eup %785 }
 0x6b2   :  { %v615_v37 = vmul.f32 %v786_v35, %v599_v21 }
 0x6b4   :  { %v623_v39 = vmul.f32 %v666_v36, %v615_v37 }
 0x6b5   :  { %v788_v40 = vpop.eup %787 }
 0x6b6   :  { %v616_v41 = vmul.f32 %v788_v40, %v600_v25  ;;  %v631_v42 = vadd.f32 %v667_v38, %v623_v39 }
 0x6b8   :  { %v624_v43 = vmul.f32 %v666_v36, %v616_v41  ;;  %633 = vst.msk [vmem:[#allocation12] sm:$0xff] %vm111_vm0, %v631_v42 }
 0x6ba   :  { %v632_v44 = vadd.f32 %v667_v38, %v624_v43 }
 0x6bc   :  { %634 = vst.msk [vmem:[#allocation12 + $0x8] sm:$0xff] %vm111_vm0, %v632_v44 }
 0x6bd   :  { %910 = shalt.err (!%p907_p2)
}
 0x6be   :  { %s911_s14 = scalar_lea.hbm %s1146_s11, 256 }
 0x6bf   :  { %p912_p3 = scmp.ne.s32.totalorder %s1146_s11, %s911_s14  ;;  %p915_p4 = scmp.lt.u32.totalorder %s911_s14, %s1146_s11 }
 0x6c1   :  { %p917_p5 = pnand %p915_p4, %p912_p3 }
 0x6c3   :  { %920 = shalt.err (!%p917_p5)
}
 0x6c4   :  { %646 = dma.vmem_to_hbm [thread:$0]  %s641_s12, 256, %s1146_s11, [#allocation5], %s931_s29, %s931_s29, %s932_s30  }
 0x6c5   :  { %927 = dma.done.wait [#allocation5], 256  }
 0x6c6   :  { %928 = vsyncadd [#allocation5], 4294967040 }
 0x6c7   :  { %650 = vsyncpa [#allocation4], 1 }
 0x6c8   :  { %651 = vsyncpa [#allocation7], 1 }
 0x6c9   :  { %652 = vsyncpa [#allocation10], 1 }
 0x6ca   :  { %653 = vsyncpa [#allocation5], 1 }

</bundles_post_ra>
